<compile_context>
chip_gen: v5e
topology: v5e:2x2
jax: 0.10.0
libtpu: 0.0.40
codegen_flags: <defaults>
</compile_context>

<pallas_src>
import functools

import jax
import jax.numpy as jnp
from jax.experimental import pallas as pl
from jax.experimental.pallas import tpu as pltpu


# ------------------------------ Fused kernel ---------------------------------
def fused_lstm_fc_kernel(*refs, T, B, H, num_layers):
    """refs layout:
        [ x_flat,                       # (T*B, D)  time-major flattened input
          w_ih0_t, w_hh0_t, bias0,      # (D,4H), (H,4H), (1,4H)
          (w_cat_l, bias_l) * (L-1),    # (2H,4H), (1,4H)   [W_ih; W_hh] stacked
          fc_w_t, fc_b,                 # (H,O), (1,O)
          out ]                         # (B,O)
    Eval-mode forward of the PyTorch LSTMModel (zero init state, last timestep
    hidden of top layer -> Linear).
    """
    x_ref = refs[0]
    w_ih0 = refs[1][...]           # (D, 4H)
    w_hh0 = refs[2][...]           # (H, 4H)
    bias0 = refs[3][...]           # (1, 4H)
    w_cat = []                     # per deeper layer: (2H, 4H)
    bias_l = []                    # per deeper layer: (1, 4H)
    for l in range(1, num_layers):
        w_cat.append(refs[4 + 2 * (l - 1)][...])
        bias_l.append(refs[5 + 2 * (l - 1)][...])
    fcw_ref = refs[4 + 2 * (num_layers - 1)]   # (H, O)
    fcb_ref = refs[5 + 2 * (num_layers - 1)]   # (1, O)
    out_ref = refs[6 + 2 * (num_layers - 1)]   # (B, O)

    def cell(gates, c_prev):
        # PyTorch gate order: input, forget, cell(g), output.
        i_g = jax.nn.sigmoid(gates[:, 0 * H:1 * H])
        f_g = jax.nn.sigmoid(gates[:, 1 * H:2 * H])
        g_g = jnp.tanh(gates[:, 2 * H:3 * H])
        o_g = jax.nn.sigmoid(gates[:, 3 * H:4 * H])
        c_new = f_g * c_prev + i_g * g_g
        h_new = o_g * jnp.tanh(c_new)
        return h_new, c_new

    # Hoisted layer-0 input projection: one large MXU matmul over all timesteps.
    #   gx0[t*B:(t+1)*B, :] == x_t @ W_ih0^T + (b_ih0 + b_hh0)
    gx0 = (
        jnp.dot(x_ref[...], w_ih0, preferred_element_type=jnp.float32)
        + bias0
    )  # (T*B, 4H)

    h = [jnp.zeros((B, H), jnp.float32) for _ in range(num_layers)]
    c = [jnp.zeros((B, H), jnp.float32) for _ in range(num_layers)]

    # Statically unrolled recurrence (serial dependence; static slice indices
    # keep everything tile-friendly and give the LLO scheduler full visibility).
    for t in range(T):
        g0 = gx0[t * B:(t + 1) * B, :] + jnp.dot(
            h[0], w_hh0, preferred_element_type=jnp.float32
        )
        h[0], c[0] = cell(g0, c[0])
        # Deeper layers: fuse input-proj(h_{l-1,t}) and recurrent-proj(h_{l,t-1})
        # into ONE matmul against the pre-concatenated (2H, 4H) weight.
        for l in range(1, num_layers):
            hin = jnp.concatenate([h[l - 1], h[l]], axis=1)          # (B, 2H)
            gl = (
                jnp.dot(hin, w_cat[l - 1], preferred_element_type=jnp.float32)
                + bias_l[l - 1]
            )
            h[l], c[l] = cell(gl, c[l])
        # TODO(synk): inter-layer LSTM dropout + post-LSTM nn.Dropout are
        # identity in eval mode, so they are intentionally omitted here.

    # Fused FC head on the last timestep's top-layer hidden state.
    out_ref[...] = (
        jnp.dot(h[-1], fcw_ref[...], preferred_element_type=jnp.float32)
        + fcb_ref[...]
    )


# --------------------------------- Wrapper ------------------------------------
def lstm_model_forward(params, x_btd):
    """x_btd: (B, T, D) float32 -> (B, output_size) float32."""
    B, T, D = x_btd.shape
    num_layers = len(params["layers"])
    H = params["layers"][0]["w_hh_t"].shape[0]
    O = params["fc_w_t"].shape[1]

    # Time-major flatten so the hoisted input projection is one matmul and each
    # per-step slice is a contiguous (B, 4H) sublane block.
    x_flat = jnp.transpose(x_btd, (1, 0, 2)).reshape(T * B, D)

    args = [x_flat]
    # Layer 0: keep W_ih and W_hh separate (input proj is hoisted).
    l0 = params["layers"][0]
    args.extend([l0["w_ih_t"], l0["w_hh_t"], l0["bias"]])
    # Layers >= 1: concatenate [W_ih; W_hh] once so each step is one matmul.
    for lp in params["layers"][1:]:
        w_cat = jnp.concatenate([lp["w_ih_t"], lp["w_hh_t"]], axis=0)  # (2H, 4H)
        args.extend([w_cat, lp["bias"]])
    args.extend([params["fc_w_t"], params["fc_b"]])

    kernel = functools.partial(
        fused_lstm_fc_kernel, T=T, B=B, H=H, num_layers=num_layers
    )
    vmem_spec = pl.BlockSpec(memory_space=pltpu.MemorySpace.VMEM)
    return pl.pallas_call(
        kernel,
        out_shape=jax.ShapeDtypeStruct((B, O), jnp.float32),
        in_specs=[vmem_spec] * len(args),
        out_specs=vmem_spec,
    )(*args)


# --------------------------- Parameter construction ---------------------------
def init_lstm_model_params(key, input_size, hidden_size, num_layers, output_size):
    """Synthetic params matching nn.LSTM / nn.Linear shapes and default init
    (U(-1/sqrt(H), 1/sqrt(H))). Weights stored pre-transposed for x @ W^T."""
    k = 1.0 / jnp.sqrt(jnp.float32(hidden_size))
    params = {"layers": []}
    for layer in range(num_layers):
        in_dim = input_size if layer == 0 else hidden_size
        key, k1, k2, k3, k4 = jax.random.split(key, 5)
        w_ih = jax.random.uniform(k1, (4 * hidden_size, in_dim), jnp.float32, -k, k)
        w_hh = jax.random.uniform(k2, (4 * hidden_size, hidden_size), jnp.float32, -k, k)
        b_ih = jax.random.uniform(k3, (4 * hidden_size,), jnp.float32, -k, k)
        b_hh = jax.random.uniform(k4, (4 * hidden_size,), jnp.float32, -k, k)
        params["layers"].append(
            {
                "w_ih_t": w_ih.T,                                  # (in_dim, 4H)
                "w_hh_t": w_hh.T,                                  # (H, 4H)
                "bias": (b_ih + b_hh).reshape(1, 4 * hidden_size), # (1, 4H) folded
            }
        )
    key, k5, k6 = jax.random.split(key, 3)
    fc_w = jax.random.uniform(k5, (output_size, hidden_size), jnp.float32, -k, k)
    fc_b = jax.random.uniform(k6, (output_size,), jnp.float32, -k, k)
    params["fc_w_t"] = fc_w.T                                      # (H, O)
    params["fc_b"] = fc_b.reshape(1, output_size)                  # (1, O)
    return params


if __name__ == "__main__":
    # Small shapes consistent with the module's forward (batch_first LSTM).
    B, T = 2, 8
    input_size, hidden_size, num_layers, output_size = 16, 32, 2, 1

    key = jax.random.PRNGKey(0)
    key, xkey, pkey = jax.random.split(key, 3)
    x = jax.random.normal(xkey, (B, T, input_size), dtype=jnp.float32)

    params = init_lstm_model_params(
        pkey, input_size, hidden_size, num_layers, output_size
    )

    fwd = jax.jit(lstm_model_forward)
    out = fwd(params, x)
    jax.block_until_ready(out)
    assert out.shape == (B, output_size), out.shape
    print("KERNEL_OK")
</pallas_src>

<mosaic_0001>
module attributes {stable_mosaic.version = 11 : i64} {
  func.func @fused_lstm_fc_kernel(%arg0: memref<16x16xf32, #tpu.memory_space<vmem>>, %arg1: memref<16x128xf32, #tpu.memory_space<vmem>>, %arg2: memref<32x128xf32, #tpu.memory_space<vmem>>, %arg3: memref<1x128xf32, #tpu.memory_space<vmem>>, %arg4: memref<64x128xf32, #tpu.memory_space<vmem>>, %arg5: memref<1x128xf32, #tpu.memory_space<vmem>>, %arg6: memref<32x1xf32, #tpu.memory_space<vmem>>, %arg7: memref<1x1xf32, #tpu.memory_space<vmem>>, %arg8: memref<2x1xf32, #tpu.memory_space<vmem>>) attributes {dimension_semantics = [], scalar_prefetch = 0 : i64, scratch_operands = 0 : i64, tpu.core_type = #tpu.core_type<tc>} {
    %c0 = arith.constant 0 : index
    %c0_0 = arith.constant 0 : index
    %0 = vector.load %arg1[%c0, %c0_0] : memref<16x128xf32, #tpu.memory_space<vmem>>, vector<16x128xf32>
    %c0_1 = arith.constant 0 : index
    %c0_2 = arith.constant 0 : index
    %1 = vector.load %arg2[%c0_1, %c0_2] : memref<32x128xf32, #tpu.memory_space<vmem>>, vector<32x128xf32>
    %c0_3 = arith.constant 0 : index
    %c0_4 = arith.constant 0 : index
    %2 = vector.load %arg3[%c0_3, %c0_4] : memref<1x128xf32, #tpu.memory_space<vmem>>, vector<1x128xf32>
    %c0_5 = arith.constant 0 : index
    %c0_6 = arith.constant 0 : index
    %3 = vector.load %arg4[%c0_5, %c0_6] : memref<64x128xf32, #tpu.memory_space<vmem>>, vector<64x128xf32>
    %c0_7 = arith.constant 0 : index
    %c0_8 = arith.constant 0 : index
    %4 = vector.load %arg5[%c0_7, %c0_8] : memref<1x128xf32, #tpu.memory_space<vmem>>, vector<1x128xf32>
    %c0_9 = arith.constant 0 : index
    %c0_10 = arith.constant 0 : index
    %5 = vector.load %arg0[%c0_9, %c0_10] : memref<16x16xf32, #tpu.memory_space<vmem>>, vector<16x16xf32>
    %cst = arith.constant dense<0.000000e+00> : vector<16x128xf32>
    %6 = tpu.matmul %5, %0, %cst {dimension_numbers = #tpu.dot_dimension_numbers<[1], [0], [0], [1], [0, 0, 1, 1], [], []>} : vector<16x16xf32>, vector<16x128xf32>, vector<16x128xf32> -> vector<16x128xf32>
    %7 = vector.broadcast %2 : vector<1x128xf32> to vector<16x128xf32>
    %8 = arith.addf %6, %7 : vector<16x128xf32>
    %cst_11 = arith.constant 0.000000e+00 : f32
    %9 = vector.broadcast %cst_11 : f32 to vector<2x32xf32>
    %cst_12 = arith.constant 0.000000e+00 : f32
    %10 = vector.broadcast %cst_12 : f32 to vector<2x32xf32>
    %cst_13 = arith.constant 0.000000e+00 : f32
    %11 = vector.broadcast %cst_13 : f32 to vector<2x32xf32>
    %cst_14 = arith.constant 0.000000e+00 : f32
    %12 = vector.broadcast %cst_14 : f32 to vector<2x32xf32>
    %13 = vector.extract_strided_slice %8 {offsets = [0, 0], sizes = [2, 128], strides = [1, 1]} : vector<16x128xf32> to vector<2x128xf32>
    %cst_15 = arith.constant dense<0.000000e+00> : vector<2x128xf32>
    %14 = tpu.matmul %9, %1, %cst_15 {dimension_numbers = #tpu.dot_dimension_numbers<[1], [0], [0], [1], [0, 0, 1, 1], [], []>} : vector<2x32xf32>, vector<32x128xf32>, vector<2x128xf32> -> vector<2x128xf32>
    %15 = arith.addf %13, %14 : vector<2x128xf32>
    %16 = vector.extract_strided_slice %15 {offsets = [0, 0], sizes = [2, 32], strides = [1, 1]} : vector<2x128xf32> to vector<2x32xf32>
    %17 = arith.negf %16 : vector<2x32xf32>
    %18 = math.exp %17 : vector<2x32xf32>
    %cst_16 = arith.constant 1.000000e+00 : f32
    %19 = vector.broadcast %cst_16 : f32 to vector<2x32xf32>
    %20 = arith.addf %19, %18 : vector<2x32xf32>
    %21 = arith.divf %19, %20 : vector<2x32xf32>
    %22 = vector.extract_strided_slice %15 {offsets = [0, 32], sizes = [2, 32], strides = [1, 1]} : vector<2x128xf32> to vector<2x32xf32>
    %23 = arith.negf %22 : vector<2x32xf32>
    %24 = math.exp %23 : vector<2x32xf32>
    %cst_17 = arith.constant 1.000000e+00 : f32
    %25 = vector.broadcast %cst_17 : f32 to vector<2x32xf32>
    %26 = arith.addf %25, %24 : vector<2x32xf32>
    %27 = arith.divf %25, %26 : vector<2x32xf32>
    %28 = vector.extract_strided_slice %15 {offsets = [0, 64], sizes = [2, 32], strides = [1, 1]} : vector<2x128xf32> to vector<2x32xf32>
    %29 = math.tanh %28 : vector<2x32xf32>
    %30 = vector.extract_strided_slice %15 {offsets = [0, 96], sizes = [2, 32], strides = [1, 1]} : vector<2x128xf32> to vector<2x32xf32>
    %31 = arith.negf %30 : vector<2x32xf32>
    %32 = math.exp %31 : vector<2x32xf32>
    %cst_18 = arith.constant 1.000000e+00 : f32
    %33 = vector.broadcast %cst_18 : f32 to vector<2x32xf32>
    %34 = arith.addf %33, %32 : vector<2x32xf32>
    %35 = arith.divf %33, %34 : vector<2x32xf32>
    %36 = arith.mulf %27, %11 : vector<2x32xf32>
    %37 = arith.mulf %21, %29 : vector<2x32xf32>
    %38 = arith.addf %36, %37 : vector<2x32xf32>
    %39 = math.tanh %38 : vector<2x32xf32>
    %40 = arith.mulf %35, %39 : vector<2x32xf32>
    %41 = tpu.concatenate %40, %10 in 1 : vector<2x32xf32>, vector<2x32xf32> -> vector<2x64xf32>
    %cst_19 = arith.constant dense<0.000000e+00> : vector<2x128xf32>
    %42 = tpu.matmul %41, %3, %cst_19 {dimension_numbers = #tpu.dot_dimension_numbers<[1], [0], [0], [1], [0, 0, 1, 1], [], []>} : vector<2x64xf32>, vector<64x128xf32>, vector<2x128xf32> -> vector<2x128xf32>
    %43 = vector.broadcast %4 : vector<1x128xf32> to vector<2x128xf32>
    %44 = arith.addf %42, %43 : vector<2x128xf32>
    %45 = vector.extract_strided_slice %44 {offsets = [0, 0], sizes = [2, 32], strides = [1, 1]} : vector<2x128xf32> to vector<2x32xf32>
    %46 = arith.negf %45 : vector<2x32xf32>
    %47 = math.exp %46 : vector<2x32xf32>
    %cst_20 = arith.constant 1.000000e+00 : f32
    %48 = vector.broadcast %cst_20 : f32 to vector<2x32xf32>
    %49 = arith.addf %48, %47 : vector<2x32xf32>
    %50 = arith.divf %48, %49 : vector<2x32xf32>
    %51 = vector.extract_strided_slice %44 {offsets = [0, 32], sizes = [2, 32], strides = [1, 1]} : vector<2x128xf32> to vector<2x32xf32>
    %52 = arith.negf %51 : vector<2x32xf32>
    %53 = math.exp %52 : vector<2x32xf32>
    %cst_21 = arith.constant 1.000000e+00 : f32
    %54 = vector.broadcast %cst_21 : f32 to vector<2x32xf32>
    %55 = arith.addf %54, %53 : vector<2x32xf32>
    %56 = arith.divf %54, %55 : vector<2x32xf32>
    %57 = vector.extract_strided_slice %44 {offsets = [0, 64], sizes = [2, 32], strides = [1, 1]} : vector<2x128xf32> to vector<2x32xf32>
    %58 = math.tanh %57 : vector<2x32xf32>
    %59 = vector.extract_strided_slice %44 {offsets = [0, 96], sizes = [2, 32], strides = [1, 1]} : vector<2x128xf32> to vector<2x32xf32>
    %60 = arith.negf %59 : vector<2x32xf32>
    %61 = math.exp %60 : vector<2x32xf32>
    %cst_22 = arith.constant 1.000000e+00 : f32
    %62 = vector.broadcast %cst_22 : f32 to vector<2x32xf32>
    %63 = arith.addf %62, %61 : vector<2x32xf32>
    %64 = arith.divf %62, %63 : vector<2x32xf32>
    %65 = arith.mulf %56, %12 : vector<2x32xf32>
    %66 = arith.mulf %50, %58 : vector<2x32xf32>
    %67 = arith.addf %65, %66 : vector<2x32xf32>
    %68 = math.tanh %67 : vector<2x32xf32>
    %69 = arith.mulf %64, %68 : vector<2x32xf32>
    %70 = vector.extract_strided_slice %8 {offsets = [2, 0], sizes = [2, 128], strides = [1, 1]} : vector<16x128xf32> to vector<2x128xf32>
    %cst_23 = arith.constant dense<0.000000e+00> : vector<2x128xf32>
    %71 = tpu.matmul %40, %1, %cst_23 {dimension_numbers = #tpu.dot_dimension_numbers<[1], [0], [0], [1], [0, 0, 1, 1], [], []>} : vector<2x32xf32>, vector<32x128xf32>, vector<2x128xf32> -> vector<2x128xf32>
    %72 = arith.addf %70, %71 : vector<2x128xf32>
    %73 = vector.extract_strided_slice %72 {offsets = [0, 0], sizes = [2, 32], strides = [1, 1]} : vector<2x128xf32> to vector<2x32xf32>
    %74 = arith.negf %73 : vector<2x32xf32>
    %75 = math.exp %74 : vector<2x32xf32>
    %cst_24 = arith.constant 1.000000e+00 : f32
    %76 = vector.broadcast %cst_24 : f32 to vector<2x32xf32>
    %77 = arith.addf %76, %75 : vector<2x32xf32>
    %78 = arith.divf %76, %77 : vector<2x32xf32>
    %79 = vector.extract_strided_slice %72 {offsets = [0, 32], sizes = [2, 32], strides = [1, 1]} : vector<2x128xf32> to vector<2x32xf32>
    %80 = arith.negf %79 : vector<2x32xf32>
    %81 = math.exp %80 : vector<2x32xf32>
    %cst_25 = arith.constant 1.000000e+00 : f32
    %82 = vector.broadcast %cst_25 : f32 to vector<2x32xf32>
    %83 = arith.addf %82, %81 : vector<2x32xf32>
    %84 = arith.divf %82, %83 : vector<2x32xf32>
    %85 = vector.extract_strided_slice %72 {offsets = [0, 64], sizes = [2, 32], strides = [1, 1]} : vector<2x128xf32> to vector<2x32xf32>
    %86 = math.tanh %85 : vector<2x32xf32>
    %87 = vector.extract_strided_slice %72 {offsets = [0, 96], sizes = [2, 32], strides = [1, 1]} : vector<2x128xf32> to vector<2x32xf32>
    %88 = arith.negf %87 : vector<2x32xf32>
    %89 = math.exp %88 : vector<2x32xf32>
    %cst_26 = arith.constant 1.000000e+00 : f32
    %90 = vector.broadcast %cst_26 : f32 to vector<2x32xf32>
    %91 = arith.addf %90, %89 : vector<2x32xf32>
    %92 = arith.divf %90, %91 : vector<2x32xf32>
    %93 = arith.mulf %84, %38 : vector<2x32xf32>
    %94 = arith.mulf %78, %86 : vector<2x32xf32>
    %95 = arith.addf %93, %94 : vector<2x32xf32>
    %96 = math.tanh %95 : vector<2x32xf32>
    %97 = arith.mulf %92, %96 : vector<2x32xf32>
    %98 = tpu.concatenate %97, %69 in 1 : vector<2x32xf32>, vector<2x32xf32> -> vector<2x64xf32>
    %cst_27 = arith.constant dense<0.000000e+00> : vector<2x128xf32>
    %99 = tpu.matmul %98, %3, %cst_27 {dimension_numbers = #tpu.dot_dimension_numbers<[1], [0], [0], [1], [0, 0, 1, 1], [], []>} : vector<2x64xf32>, vector<64x128xf32>, vector<2x128xf32> -> vector<2x128xf32>
    %100 = vector.broadcast %4 : vector<1x128xf32> to vector<2x128xf32>
    %101 = arith.addf %99, %100 : vector<2x128xf32>
    %102 = vector.extract_strided_slice %101 {offsets = [0, 0], sizes = [2, 32], strides = [1, 1]} : vector<2x128xf32> to vector<2x32xf32>
    %103 = arith.negf %102 : vector<2x32xf32>
    %104 = math.exp %103 : vector<2x32xf32>
    %cst_28 = arith.constant 1.000000e+00 : f32
    %105 = vector.broadcast %cst_28 : f32 to vector<2x32xf32>
    %106 = arith.addf %105, %104 : vector<2x32xf32>
    %107 = arith.divf %105, %106 : vector<2x32xf32>
    %108 = vector.extract_strided_slice %101 {offsets = [0, 32], sizes = [2, 32], strides = [1, 1]} : vector<2x128xf32> to vector<2x32xf32>
    %109 = arith.negf %108 : vector<2x32xf32>
    %110 = math.exp %109 : vector<2x32xf32>
    %cst_29 = arith.constant 1.000000e+00 : f32
    %111 = vector.broadcast %cst_29 : f32 to vector<2x32xf32>
    %112 = arith.addf %111, %110 : vector<2x32xf32>
    %113 = arith.divf %111, %112 : vector<2x32xf32>
    %114 = vector.extract_strided_slice %101 {offsets = [0, 64], sizes = [2, 32], strides = [1, 1]} : vector<2x128xf32> to vector<2x32xf32>
    %115 = math.tanh %114 : vector<2x32xf32>
    %116 = vector.extract_strided_slice %101 {offsets = [0, 96], sizes = [2, 32], strides = [1, 1]} : vector<2x128xf32> to vector<2x32xf32>
    %117 = arith.negf %116 : vector<2x32xf32>
    %118 = math.exp %117 : vector<2x32xf32>
    %cst_30 = arith.constant 1.000000e+00 : f32
    %119 = vector.broadcast %cst_30 : f32 to vector<2x32xf32>
    %120 = arith.addf %119, %118 : vector<2x32xf32>
    %121 = arith.divf %119, %120 : vector<2x32xf32>
    %122 = arith.mulf %113, %67 : vector<2x32xf32>
    %123 = arith.mulf %107, %115 : vector<2x32xf32>
    %124 = arith.addf %122, %123 : vector<2x32xf32>
    %125 = math.tanh %124 : vector<2x32xf32>
    %126 = arith.mulf %121, %125 : vector<2x32xf32>
    %127 = vector.extract_strided_slice %8 {offsets = [4, 0], sizes = [2, 128], strides = [1, 1]} : vector<16x128xf32> to vector<2x128xf32>
    %cst_31 = arith.constant dense<0.000000e+00> : vector<2x128xf32>
    %128 = tpu.matmul %97, %1, %cst_31 {dimension_numbers = #tpu.dot_dimension_numbers<[1], [0], [0], [1], [0, 0, 1, 1], [], []>} : vector<2x32xf32>, vector<32x128xf32>, vector<2x128xf32> -> vector<2x128xf32>
    %129 = arith.addf %127, %128 : vector<2x128xf32>
    %130 = vector.extract_strided_slice %129 {offsets = [0, 0], sizes = [2, 32], strides = [1, 1]} : vector<2x128xf32> to vector<2x32xf32>
    %131 = arith.negf %130 : vector<2x32xf32>
    %132 = math.exp %131 : vector<2x32xf32>
    %cst_32 = arith.constant 1.000000e+00 : f32
    %133 = vector.broadcast %cst_32 : f32 to vector<2x32xf32>
    %134 = arith.addf %133, %132 : vector<2x32xf32>
    %135 = arith.divf %133, %134 : vector<2x32xf32>
    %136 = vector.extract_strided_slice %129 {offsets = [0, 32], sizes = [2, 32], strides = [1, 1]} : vector<2x128xf32> to vector<2x32xf32>
    %137 = arith.negf %136 : vector<2x32xf32>
    %138 = math.exp %137 : vector<2x32xf32>
    %cst_33 = arith.constant 1.000000e+00 : f32
    %139 = vector.broadcast %cst_33 : f32 to vector<2x32xf32>
    %140 = arith.addf %139, %138 : vector<2x32xf32>
    %141 = arith.divf %139, %140 : vector<2x32xf32>
    %142 = vector.extract_strided_slice %129 {offsets = [0, 64], sizes = [2, 32], strides = [1, 1]} : vector<2x128xf32> to vector<2x32xf32>
    %143 = math.tanh %142 : vector<2x32xf32>
    %144 = vector.extract_strided_slice %129 {offsets = [0, 96], sizes = [2, 32], strides = [1, 1]} : vector<2x128xf32> to vector<2x32xf32>
    %145 = arith.negf %144 : vector<2x32xf32>
    %146 = math.exp %145 : vector<2x32xf32>
    %cst_34 = arith.constant 1.000000e+00 : f32
    %147 = vector.broadcast %cst_34 : f32 to vector<2x32xf32>
    %148 = arith.addf %147, %146 : vector<2x32xf32>
    %149 = arith.divf %147, %148 : vector<2x32xf32>
    %150 = arith.mulf %141, %95 : vector<2x32xf32>
    %151 = arith.mulf %135, %143 : vector<2x32xf32>
    %152 = arith.addf %150, %151 : vector<2x32xf32>
    %153 = math.tanh %152 : vector<2x32xf32>
    %154 = arith.mulf %149, %153 : vector<2x32xf32>
    %155 = tpu.concatenate %154, %126 in 1 : vector<2x32xf32>, vector<2x32xf32> -> vector<2x64xf32>
    %cst_35 = arith.constant dense<0.000000e+00> : vector<2x128xf32>
    %156 = tpu.matmul %155, %3, %cst_35 {dimension_numbers = #tpu.dot_dimension_numbers<[1], [0], [0], [1], [0, 0, 1, 1], [], []>} : vector<2x64xf32>, vector<64x128xf32>, vector<2x128xf32> -> vector<2x128xf32>
    %157 = vector.broadcast %4 : vector<1x128xf32> to vector<2x128xf32>
    %158 = arith.addf %156, %157 : vector<2x128xf32>
    %159 = vector.extract_strided_slice %158 {offsets = [0, 0], sizes = [2, 32], strides = [1, 1]} : vector<2x128xf32> to vector<2x32xf32>
    %160 = arith.negf %159 : vector<2x32xf32>
    %161 = math.exp %160 : vector<2x32xf32>
    %cst_36 = arith.constant 1.000000e+00 : f32
    %162 = vector.broadcast %cst_36 : f32 to vector<2x32xf32>
    %163 = arith.addf %162, %161 : vector<2x32xf32>
    %164 = arith.divf %162, %163 : vector<2x32xf32>
    %165 = vector.extract_strided_slice %158 {offsets = [0, 32], sizes = [2, 32], strides = [1, 1]} : vector<2x128xf32> to vector<2x32xf32>
    %166 = arith.negf %165 : vector<2x32xf32>
    %167 = math.exp %166 : vector<2x32xf32>
    %cst_37 = arith.constant 1.000000e+00 : f32
    %168 = vector.broadcast %cst_37 : f32 to vector<2x32xf32>
    %169 = arith.addf %168, %167 : vector<2x32xf32>
    %170 = arith.divf %168, %169 : vector<2x32xf32>
    %171 = vector.extract_strided_slice %158 {offsets = [0, 64], sizes = [2, 32], strides = [1, 1]} : vector<2x128xf32> to vector<2x32xf32>
    %172 = math.tanh %171 : vector<2x32xf32>
    %173 = vector.extract_strided_slice %158 {offsets = [0, 96], sizes = [2, 32], strides = [1, 1]} : vector<2x128xf32> to vector<2x32xf32>
    %174 = arith.negf %173 : vector<2x32xf32>
    %175 = math.exp %174 : vector<2x32xf32>
    %cst_38 = arith.constant 1.000000e+00 : f32
    %176 = vector.broadcast %cst_38 : f32 to vector<2x32xf32>
    %177 = arith.addf %176, %175 : vector<2x32xf32>
    %178 = arith.divf %176, %177 : vector<2x32xf32>
    %179 = arith.mulf %170, %124 : vector<2x32xf32>
    %180 = arith.mulf %164, %172 : vector<2x32xf32>
    %181 = arith.addf %179, %180 : vector<2x32xf32>
    %182 = math.tanh %181 : vector<2x32xf32>
    %183 = arith.mulf %178, %182 : vector<2x32xf32>
    %184 = vector.extract_strided_slice %8 {offsets = [6, 0], sizes = [2, 128], strides = [1, 1]} : vector<16x128xf32> to vector<2x128xf32>
    %cst_39 = arith.constant dense<0.000000e+00> : vector<2x128xf32>
    %185 = tpu.matmul %154, %1, %cst_39 {dimension_numbers = #tpu.dot_dimension_numbers<[1], [0], [0], [1], [0, 0, 1, 1], [], []>} : vector<2x32xf32>, vector<32x128xf32>, vector<2x128xf32> -> vector<2x128xf32>
    %186 = arith.addf %184, %185 : vector<2x128xf32>
    %187 = vector.extract_strided_slice %186 {offsets = [0, 0], sizes = [2, 32], strides = [1, 1]} : vector<2x128xf32> to vector<2x32xf32>
    %188 = arith.negf %187 : vector<2x32xf32>
    %189 = math.exp %188 : vector<2x32xf32>
    %cst_40 = arith.constant 1.000000e+00 : f32
    %190 = vector.broadcast %cst_40 : f32 to vector<2x32xf32>
    %191 = arith.addf %190, %189 : vector<2x32xf32>
    %192 = arith.divf %190, %191 : vector<2x32xf32>
    %193 = vector.extract_strided_slice %186 {offsets = [0, 32], sizes = [2, 32], strides = [1, 1]} : vector<2x128xf32> to vector<2x32xf32>
    %194 = arith.negf %193 : vector<2x32xf32>
    %195 = math.exp %194 : vector<2x32xf32>
    %cst_41 = arith.constant 1.000000e+00 : f32
    %196 = vector.broadcast %cst_41 : f32 to vector<2x32xf32>
    %197 = arith.addf %196, %195 : vector<2x32xf32>
    %198 = arith.divf %196, %197 : vector<2x32xf32>
    %199 = vector.extract_strided_slice %186 {offsets = [0, 64], sizes = [2, 32], strides = [1, 1]} : vector<2x128xf32> to vector<2x32xf32>
    %200 = math.tanh %199 : vector<2x32xf32>
    %201 = vector.extract_strided_slice %186 {offsets = [0, 96], sizes = [2, 32], strides = [1, 1]} : vector<2x128xf32> to vector<2x32xf32>
    %202 = arith.negf %201 : vector<2x32xf32>
    %203 = math.exp %202 : vector<2x32xf32>
    %cst_42 = arith.constant 1.000000e+00 : f32
    %204 = vector.broadcast %cst_42 : f32 to vector<2x32xf32>
    %205 = arith.addf %204, %203 : vector<2x32xf32>
    %206 = arith.divf %204, %205 : vector<2x32xf32>
    %207 = arith.mulf %198, %152 : vector<2x32xf32>
    %208 = arith.mulf %192, %200 : vector<2x32xf32>
    %209 = arith.addf %207, %208 : vector<2x32xf32>
    %210 = math.tanh %209 : vector<2x32xf32>
    %211 = arith.mulf %206, %210 : vector<2x32xf32>
    %212 = tpu.concatenate %211, %183 in 1 : vector<2x32xf32>, vector<2x32xf32> -> vector<2x64xf32>
    %cst_43 = arith.constant dense<0.000000e+00> : vector<2x128xf32>
    %213 = tpu.matmul %212, %3, %cst_43 {dimension_numbers = #tpu.dot_dimension_numbers<[1], [0], [0], [1], [0, 0, 1, 1], [], []>} : vector<2x64xf32>, vector<64x128xf32>, vector<2x128xf32> -> vector<2x128xf32>
    %214 = vector.broadcast %4 : vector<1x128xf32> to vector<2x128xf32>
    %215 = arith.addf %213, %214 : vector<2x128xf32>
    %216 = vector.extract_strided_slice %215 {offsets = [0, 0], sizes = [2, 32], strides = [1, 1]} : vector<2x128xf32> to vector<2x32xf32>
    %217 = arith.negf %216 : vector<2x32xf32>
    %218 = math.exp %217 : vector<2x32xf32>
    %cst_44 = arith.constant 1.000000e+00 : f32
    %219 = vector.broadcast %cst_44 : f32 to vector<2x32xf32>
    %220 = arith.addf %219, %218 : vector<2x32xf32>
    %221 = arith.divf %219, %220 : vector<2x32xf32>
    %222 = vector.extract_strided_slice %215 {offsets = [0, 32], sizes = [2, 32], strides = [1, 1]} : vector<2x128xf32> to vector<2x32xf32>
    %223 = arith.negf %222 : vector<2x32xf32>
    %224 = math.exp %223 : vector<2x32xf32>
    %cst_45 = arith.constant 1.000000e+00 : f32
    %225 = vector.broadcast %cst_45 : f32 to vector<2x32xf32>
    %226 = arith.addf %225, %224 : vector<2x32xf32>
    %227 = arith.divf %225, %226 : vector<2x32xf32>
    %228 = vector.extract_strided_slice %215 {offsets = [0, 64], sizes = [2, 32], strides = [1, 1]} : vector<2x128xf32> to vector<2x32xf32>
    %229 = math.tanh %228 : vector<2x32xf32>
    %230 = vector.extract_strided_slice %215 {offsets = [0, 96], sizes = [2, 32], strides = [1, 1]} : vector<2x128xf32> to vector<2x32xf32>
    %231 = arith.negf %230 : vector<2x32xf32>
    %232 = math.exp %231 : vector<2x32xf32>
    %cst_46 = arith.constant 1.000000e+00 : f32
    %233 = vector.broadcast %cst_46 : f32 to vector<2x32xf32>
    %234 = arith.addf %233, %232 : vector<2x32xf32>
    %235 = arith.divf %233, %234 : vector<2x32xf32>
    %236 = arith.mulf %227, %181 : vector<2x32xf32>
    %237 = arith.mulf %221, %229 : vector<2x32xf32>
    %238 = arith.addf %236, %237 : vector<2x32xf32>
    %239 = math.tanh %238 : vector<2x32xf32>
    %240 = arith.mulf %235, %239 : vector<2x32xf32>
    %241 = vector.extract_strided_slice %8 {offsets = [8, 0], sizes = [2, 128], strides = [1, 1]} : vector<16x128xf32> to vector<2x128xf32>
    %cst_47 = arith.constant dense<0.000000e+00> : vector<2x128xf32>
    %242 = tpu.matmul %211, %1, %cst_47 {dimension_numbers = #tpu.dot_dimension_numbers<[1], [0], [0], [1], [0, 0, 1, 1], [], []>} : vector<2x32xf32>, vector<32x128xf32>, vector<2x128xf32> -> vector<2x128xf32>
    %243 = arith.addf %241, %242 : vector<2x128xf32>
    %244 = vector.extract_strided_slice %243 {offsets = [0, 0], sizes = [2, 32], strides = [1, 1]} : vector<2x128xf32> to vector<2x32xf32>
    %245 = arith.negf %244 : vector<2x32xf32>
    %246 = math.exp %245 : vector<2x32xf32>
    %cst_48 = arith.constant 1.000000e+00 : f32
    %247 = vector.broadcast %cst_48 : f32 to vector<2x32xf32>
    %248 = arith.addf %247, %246 : vector<2x32xf32>
    %249 = arith.divf %247, %248 : vector<2x32xf32>
    %250 = vector.extract_strided_slice %243 {offsets = [0, 32], sizes = [2, 32], strides = [1, 1]} : vector<2x128xf32> to vector<2x32xf32>
    %251 = arith.negf %250 : vector<2x32xf32>
    %252 = math.exp %251 : vector<2x32xf32>
    %cst_49 = arith.constant 1.000000e+00 : f32
    %253 = vector.broadcast %cst_49 : f32 to vector<2x32xf32>
    %254 = arith.addf %253, %252 : vector<2x32xf32>
    %255 = arith.divf %253, %254 : vector<2x32xf32>
    %256 = vector.extract_strided_slice %243 {offsets = [0, 64], sizes = [2, 32], strides = [1, 1]} : vector<2x128xf32> to vector<2x32xf32>
    %257 = math.tanh %256 : vector<2x32xf32>
    %258 = vector.extract_strided_slice %243 {offsets = [0, 96], sizes = [2, 32], strides = [1, 1]} : vector<2x128xf32> to vector<2x32xf32>
    %259 = arith.negf %258 : vector<2x32xf32>
    %260 = math.exp %259 : vector<2x32xf32>
    %cst_50 = arith.constant 1.000000e+00 : f32
    %261 = vector.broadcast %cst_50 : f32 to vector<2x32xf32>
    %262 = arith.addf %261, %260 : vector<2x32xf32>
    %263 = arith.divf %261, %262 : vector<2x32xf32>
    %264 = arith.mulf %255, %209 : vector<2x32xf32>
    %265 = arith.mulf %249, %257 : vector<2x32xf32>
    %266 = arith.addf %264, %265 : vector<2x32xf32>
    %267 = math.tanh %266 : vector<2x32xf32>
    %268 = arith.mulf %263, %267 : vector<2x32xf32>
    %269 = tpu.concatenate %268, %240 in 1 : vector<2x32xf32>, vector<2x32xf32> -> vector<2x64xf32>
    %cst_51 = arith.constant dense<0.000000e+00> : vector<2x128xf32>
    %270 = tpu.matmul %269, %3, %cst_51 {dimension_numbers = #tpu.dot_dimension_numbers<[1], [0], [0], [1], [0, 0, 1, 1], [], []>} : vector<2x64xf32>, vector<64x128xf32>, vector<2x128xf32> -> vector<2x128xf32>
    %271 = vector.broadcast %4 : vector<1x128xf32> to vector<2x128xf32>
    %272 = arith.addf %270, %271 : vector<2x128xf32>
    %273 = vector.extract_strided_slice %272 {offsets = [0, 0], sizes = [2, 32], strides = [1, 1]} : vector<2x128xf32> to vector<2x32xf32>
    %274 = arith.negf %273 : vector<2x32xf32>
    %275 = math.exp %274 : vector<2x32xf32>
    %cst_52 = arith.constant 1.000000e+00 : f32
    %276 = vector.broadcast %cst_52 : f32 to vector<2x32xf32>
    %277 = arith.addf %276, %275 : vector<2x32xf32>
    %278 = arith.divf %276, %277 : vector<2x32xf32>
    %279 = vector.extract_strided_slice %272 {offsets = [0, 32], sizes = [2, 32], strides = [1, 1]} : vector<2x128xf32> to vector<2x32xf32>
    %280 = arith.negf %279 : vector<2x32xf32>
    %281 = math.exp %280 : vector<2x32xf32>
    %cst_53 = arith.constant 1.000000e+00 : f32
    %282 = vector.broadcast %cst_53 : f32 to vector<2x32xf32>
    %283 = arith.addf %282, %281 : vector<2x32xf32>
    %284 = arith.divf %282, %283 : vector<2x32xf32>
    %285 = vector.extract_strided_slice %272 {offsets = [0, 64], sizes = [2, 32], strides = [1, 1]} : vector<2x128xf32> to vector<2x32xf32>
    %286 = math.tanh %285 : vector<2x32xf32>
    %287 = vector.extract_strided_slice %272 {offsets = [0, 96], sizes = [2, 32], strides = [1, 1]} : vector<2x128xf32> to vector<2x32xf32>
    %288 = arith.negf %287 : vector<2x32xf32>
    %289 = math.exp %288 : vector<2x32xf32>
    %cst_54 = arith.constant 1.000000e+00 : f32
    %290 = vector.broadcast %cst_54 : f32 to vector<2x32xf32>
    %291 = arith.addf %290, %289 : vector<2x32xf32>
    %292 = arith.divf %290, %291 : vector<2x32xf32>
    %293 = arith.mulf %284, %238 : vector<2x32xf32>
    %294 = arith.mulf %278, %286 : vector<2x32xf32>
    %295 = arith.addf %293, %294 : vector<2x32xf32>
    %296 = math.tanh %295 : vector<2x32xf32>
    %297 = arith.mulf %292, %296 : vector<2x32xf32>
    %298 = vector.extract_strided_slice %8 {offsets = [10, 0], sizes = [2, 128], strides = [1, 1]} : vector<16x128xf32> to vector<2x128xf32>
    %cst_55 = arith.constant dense<0.000000e+00> : vector<2x128xf32>
    %299 = tpu.matmul %268, %1, %cst_55 {dimension_numbers = #tpu.dot_dimension_numbers<[1], [0], [0], [1], [0, 0, 1, 1], [], []>} : vector<2x32xf32>, vector<32x128xf32>, vector<2x128xf32> -> vector<2x128xf32>
    %300 = arith.addf %298, %299 : vector<2x128xf32>
    %301 = vector.extract_strided_slice %300 {offsets = [0, 0], sizes = [2, 32], strides = [1, 1]} : vector<2x128xf32> to vector<2x32xf32>
    %302 = arith.negf %301 : vector<2x32xf32>
    %303 = math.exp %302 : vector<2x32xf32>
    %cst_56 = arith.constant 1.000000e+00 : f32
    %304 = vector.broadcast %cst_56 : f32 to vector<2x32xf32>
    %305 = arith.addf %304, %303 : vector<2x32xf32>
    %306 = arith.divf %304, %305 : vector<2x32xf32>
    %307 = vector.extract_strided_slice %300 {offsets = [0, 32], sizes = [2, 32], strides = [1, 1]} : vector<2x128xf32> to vector<2x32xf32>
    %308 = arith.negf %307 : vector<2x32xf32>
    %309 = math.exp %308 : vector<2x32xf32>
    %cst_57 = arith.constant 1.000000e+00 : f32
    %310 = vector.broadcast %cst_57 : f32 to vector<2x32xf32>
    %311 = arith.addf %310, %309 : vector<2x32xf32>
    %312 = arith.divf %310, %311 : vector<2x32xf32>
    %313 = vector.extract_strided_slice %300 {offsets = [0, 64], sizes = [2, 32], strides = [1, 1]} : vector<2x128xf32> to vector<2x32xf32>
    %314 = math.tanh %313 : vector<2x32xf32>
    %315 = vector.extract_strided_slice %300 {offsets = [0, 96], sizes = [2, 32], strides = [1, 1]} : vector<2x128xf32> to vector<2x32xf32>
    %316 = arith.negf %315 : vector<2x32xf32>
    %317 = math.exp %316 : vector<2x32xf32>
    %cst_58 = arith.constant 1.000000e+00 : f32
    %318 = vector.broadcast %cst_58 : f32 to vector<2x32xf32>
    %319 = arith.addf %318, %317 : vector<2x32xf32>
    %320 = arith.divf %318, %319 : vector<2x32xf32>
    %321 = arith.mulf %312, %266 : vector<2x32xf32>
    %322 = arith.mulf %306, %314 : vector<2x32xf32>
    %323 = arith.addf %321, %322 : vector<2x32xf32>
    %324 = math.tanh %323 : vector<2x32xf32>
    %325 = arith.mulf %320, %324 : vector<2x32xf32>
    %326 = tpu.concatenate %325, %297 in 1 : vector<2x32xf32>, vector<2x32xf32> -> vector<2x64xf32>
    %cst_59 = arith.constant dense<0.000000e+00> : vector<2x128xf32>
    %327 = tpu.matmul %326, %3, %cst_59 {dimension_numbers = #tpu.dot_dimension_numbers<[1], [0], [0], [1], [0, 0, 1, 1], [], []>} : vector<2x64xf32>, vector<64x128xf32>, vector<2x128xf32> -> vector<2x128xf32>
    %328 = vector.broadcast %4 : vector<1x128xf32> to vector<2x128xf32>
    %329 = arith.addf %327, %328 : vector<2x128xf32>
    %330 = vector.extract_strided_slice %329 {offsets = [0, 0], sizes = [2, 32], strides = [1, 1]} : vector<2x128xf32> to vector<2x32xf32>
    %331 = arith.negf %330 : vector<2x32xf32>
    %332 = math.exp %331 : vector<2x32xf32>
    %cst_60 = arith.constant 1.000000e+00 : f32
    %333 = vector.broadcast %cst_60 : f32 to vector<2x32xf32>
    %334 = arith.addf %333, %332 : vector<2x32xf32>
    %335 = arith.divf %333, %334 : vector<2x32xf32>
    %336 = vector.extract_strided_slice %329 {offsets = [0, 32], sizes = [2, 32], strides = [1, 1]} : vector<2x128xf32> to vector<2x32xf32>
    %337 = arith.negf %336 : vector<2x32xf32>
    %338 = math.exp %337 : vector<2x32xf32>
    %cst_61 = arith.constant 1.000000e+00 : f32
    %339 = vector.broadcast %cst_61 : f32 to vector<2x32xf32>
    %340 = arith.addf %339, %338 : vector<2x32xf32>
    %341 = arith.divf %339, %340 : vector<2x32xf32>
    %342 = vector.extract_strided_slice %329 {offsets = [0, 64], sizes = [2, 32], strides = [1, 1]} : vector<2x128xf32> to vector<2x32xf32>
    %343 = math.tanh %342 : vector<2x32xf32>
    %344 = vector.extract_strided_slice %329 {offsets = [0, 96], sizes = [2, 32], strides = [1, 1]} : vector<2x128xf32> to vector<2x32xf32>
    %345 = arith.negf %344 : vector<2x32xf32>
    %346 = math.exp %345 : vector<2x32xf32>
    %cst_62 = arith.constant 1.000000e+00 : f32
    %347 = vector.broadcast %cst_62 : f32 to vector<2x32xf32>
    %348 = arith.addf %347, %346 : vector<2x32xf32>
    %349 = arith.divf %347, %348 : vector<2x32xf32>
    %350 = arith.mulf %341, %295 : vector<2x32xf32>
    %351 = arith.mulf %335, %343 : vector<2x32xf32>
    %352 = arith.addf %350, %351 : vector<2x32xf32>
    %353 = math.tanh %352 : vector<2x32xf32>
    %354 = arith.mulf %349, %353 : vector<2x32xf32>
    %355 = vector.extract_strided_slice %8 {offsets = [12, 0], sizes = [2, 128], strides = [1, 1]} : vector<16x128xf32> to vector<2x128xf32>
    %cst_63 = arith.constant dense<0.000000e+00> : vector<2x128xf32>
    %356 = tpu.matmul %325, %1, %cst_63 {dimension_numbers = #tpu.dot_dimension_numbers<[1], [0], [0], [1], [0, 0, 1, 1], [], []>} : vector<2x32xf32>, vector<32x128xf32>, vector<2x128xf32> -> vector<2x128xf32>
    %357 = arith.addf %355, %356 : vector<2x128xf32>
    %358 = vector.extract_strided_slice %357 {offsets = [0, 0], sizes = [2, 32], strides = [1, 1]} : vector<2x128xf32> to vector<2x32xf32>
    %359 = arith.negf %358 : vector<2x32xf32>
    %360 = math.exp %359 : vector<2x32xf32>
    %cst_64 = arith.constant 1.000000e+00 : f32
    %361 = vector.broadcast %cst_64 : f32 to vector<2x32xf32>
    %362 = arith.addf %361, %360 : vector<2x32xf32>
    %363 = arith.divf %361, %362 : vector<2x32xf32>
    %364 = vector.extract_strided_slice %357 {offsets = [0, 32], sizes = [2, 32], strides = [1, 1]} : vector<2x128xf32> to vector<2x32xf32>
    %365 = arith.negf %364 : vector<2x32xf32>
    %366 = math.exp %365 : vector<2x32xf32>
    %cst_65 = arith.constant 1.000000e+00 : f32
    %367 = vector.broadcast %cst_65 : f32 to vector<2x32xf32>
    %368 = arith.addf %367, %366 : vector<2x32xf32>
    %369 = arith.divf %367, %368 : vector<2x32xf32>
    %370 = vector.extract_strided_slice %357 {offsets = [0, 64], sizes = [2, 32], strides = [1, 1]} : vector<2x128xf32> to vector<2x32xf32>
    %371 = math.tanh %370 : vector<2x32xf32>
    %372 = vector.extract_strided_slice %357 {offsets = [0, 96], sizes = [2, 32], strides = [1, 1]} : vector<2x128xf32> to vector<2x32xf32>
    %373 = arith.negf %372 : vector<2x32xf32>
    %374 = math.exp %373 : vector<2x32xf32>
    %cst_66 = arith.constant 1.000000e+00 : f32
    %375 = vector.broadcast %cst_66 : f32 to vector<2x32xf32>
    %376 = arith.addf %375, %374 : vector<2x32xf32>
    %377 = arith.divf %375, %376 : vector<2x32xf32>
    %378 = arith.mulf %369, %323 : vector<2x32xf32>
    %379 = arith.mulf %363, %371 : vector<2x32xf32>
    %380 = arith.addf %378, %379 : vector<2x32xf32>
    %381 = math.tanh %380 : vector<2x32xf32>
    %382 = arith.mulf %377, %381 : vector<2x32xf32>
    %383 = tpu.concatenate %382, %354 in 1 : vector<2x32xf32>, vector<2x32xf32> -> vector<2x64xf32>
    %cst_67 = arith.constant dense<0.000000e+00> : vector<2x128xf32>
    %384 = tpu.matmul %383, %3, %cst_67 {dimension_numbers = #tpu.dot_dimension_numbers<[1], [0], [0], [1], [0, 0, 1, 1], [], []>} : vector<2x64xf32>, vector<64x128xf32>, vector<2x128xf32> -> vector<2x128xf32>
    %385 = vector.broadcast %4 : vector<1x128xf32> to vector<2x128xf32>
    %386 = arith.addf %384, %385 : vector<2x128xf32>
    %387 = vector.extract_strided_slice %386 {offsets = [0, 0], sizes = [2, 32], strides = [1, 1]} : vector<2x128xf32> to vector<2x32xf32>
    %388 = arith.negf %387 : vector<2x32xf32>
    %389 = math.exp %388 : vector<2x32xf32>
    %cst_68 = arith.constant 1.000000e+00 : f32
    %390 = vector.broadcast %cst_68 : f32 to vector<2x32xf32>
    %391 = arith.addf %390, %389 : vector<2x32xf32>
    %392 = arith.divf %390, %391 : vector<2x32xf32>
    %393 = vector.extract_strided_slice %386 {offsets = [0, 32], sizes = [2, 32], strides = [1, 1]} : vector<2x128xf32> to vector<2x32xf32>
    %394 = arith.negf %393 : vector<2x32xf32>
    %395 = math.exp %394 : vector<2x32xf32>
    %cst_69 = arith.constant 1.000000e+00 : f32
    %396 = vector.broadcast %cst_69 : f32 to vector<2x32xf32>
    %397 = arith.addf %396, %395 : vector<2x32xf32>
    %398 = arith.divf %396, %397 : vector<2x32xf32>
    %399 = vector.extract_strided_slice %386 {offsets = [0, 64], sizes = [2, 32], strides = [1, 1]} : vector<2x128xf32> to vector<2x32xf32>
    %400 = math.tanh %399 : vector<2x32xf32>
    %401 = vector.extract_strided_slice %386 {offsets = [0, 96], sizes = [2, 32], strides = [1, 1]} : vector<2x128xf32> to vector<2x32xf32>
    %402 = arith.negf %401 : vector<2x32xf32>
    %403 = math.exp %402 : vector<2x32xf32>
    %cst_70 = arith.constant 1.000000e+00 : f32
    %404 = vector.broadcast %cst_70 : f32 to vector<2x32xf32>
    %405 = arith.addf %404, %403 : vector<2x32xf32>
    %406 = arith.divf %404, %405 : vector<2x32xf32>
    %407 = arith.mulf %398, %352 : vector<2x32xf32>
    %408 = arith.mulf %392, %400 : vector<2x32xf32>
    %409 = arith.addf %407, %408 : vector<2x32xf32>
    %410 = math.tanh %409 : vector<2x32xf32>
    %411 = arith.mulf %406, %410 : vector<2x32xf32>
    %412 = vector.extract_strided_slice %8 {offsets = [14, 0], sizes = [2, 128], strides = [1, 1]} : vector<16x128xf32> to vector<2x128xf32>
    %cst_71 = arith.constant dense<0.000000e+00> : vector<2x128xf32>
    %413 = tpu.matmul %382, %1, %cst_71 {dimension_numbers = #tpu.dot_dimension_numbers<[1], [0], [0], [1], [0, 0, 1, 1], [], []>} : vector<2x32xf32>, vector<32x128xf32>, vector<2x128xf32> -> vector<2x128xf32>
    %414 = arith.addf %412, %413 : vector<2x128xf32>
    %415 = vector.extract_strided_slice %414 {offsets = [0, 0], sizes = [2, 32], strides = [1, 1]} : vector<2x128xf32> to vector<2x32xf32>
    %416 = arith.negf %415 : vector<2x32xf32>
    %417 = math.exp %416 : vector<2x32xf32>
    %cst_72 = arith.constant 1.000000e+00 : f32
    %418 = vector.broadcast %cst_72 : f32 to vector<2x32xf32>
    %419 = arith.addf %418, %417 : vector<2x32xf32>
    %420 = arith.divf %418, %419 : vector<2x32xf32>
    %421 = vector.extract_strided_slice %414 {offsets = [0, 32], sizes = [2, 32], strides = [1, 1]} : vector<2x128xf32> to vector<2x32xf32>
    %422 = arith.negf %421 : vector<2x32xf32>
    %423 = math.exp %422 : vector<2x32xf32>
    %cst_73 = arith.constant 1.000000e+00 : f32
    %424 = vector.broadcast %cst_73 : f32 to vector<2x32xf32>
    %425 = arith.addf %424, %423 : vector<2x32xf32>
    %426 = arith.divf %424, %425 : vector<2x32xf32>
    %427 = vector.extract_strided_slice %414 {offsets = [0, 64], sizes = [2, 32], strides = [1, 1]} : vector<2x128xf32> to vector<2x32xf32>
    %428 = math.tanh %427 : vector<2x32xf32>
    %429 = vector.extract_strided_slice %414 {offsets = [0, 96], sizes = [2, 32], strides = [1, 1]} : vector<2x128xf32> to vector<2x32xf32>
    %430 = arith.negf %429 : vector<2x32xf32>
    %431 = math.exp %430 : vector<2x32xf32>
    %cst_74 = arith.constant 1.000000e+00 : f32
    %432 = vector.broadcast %cst_74 : f32 to vector<2x32xf32>
    %433 = arith.addf %432, %431 : vector<2x32xf32>
    %434 = arith.divf %432, %433 : vector<2x32xf32>
    %435 = arith.mulf %426, %380 : vector<2x32xf32>
    %436 = arith.mulf %420, %428 : vector<2x32xf32>
    %437 = arith.addf %435, %436 : vector<2x32xf32>
    %438 = math.tanh %437 : vector<2x32xf32>
    %439 = arith.mulf %434, %438 : vector<2x32xf32>
    %440 = tpu.concatenate %439, %411 in 1 : vector<2x32xf32>, vector<2x32xf32> -> vector<2x64xf32>
    %cst_75 = arith.constant dense<0.000000e+00> : vector<2x128xf32>
    %441 = tpu.matmul %440, %3, %cst_75 {dimension_numbers = #tpu.dot_dimension_numbers<[1], [0], [0], [1], [0, 0, 1, 1], [], []>} : vector<2x64xf32>, vector<64x128xf32>, vector<2x128xf32> -> vector<2x128xf32>
    %442 = vector.broadcast %4 : vector<1x128xf32> to vector<2x128xf32>
    %443 = arith.addf %441, %442 : vector<2x128xf32>
    %444 = vector.extract_strided_slice %443 {offsets = [0, 0], sizes = [2, 32], strides = [1, 1]} : vector<2x128xf32> to vector<2x32xf32>
    %445 = arith.negf %444 : vector<2x32xf32>
    %446 = math.exp %445 : vector<2x32xf32>
    %cst_76 = arith.constant 1.000000e+00 : f32
    %447 = vector.broadcast %cst_76 : f32 to vector<2x32xf32>
    %448 = arith.addf %447, %446 : vector<2x32xf32>
    %449 = arith.divf %447, %448 : vector<2x32xf32>
    %450 = vector.extract_strided_slice %443 {offsets = [0, 32], sizes = [2, 32], strides = [1, 1]} : vector<2x128xf32> to vector<2x32xf32>
    %451 = arith.negf %450 : vector<2x32xf32>
    %452 = math.exp %451 : vector<2x32xf32>
    %cst_77 = arith.constant 1.000000e+00 : f32
    %453 = vector.broadcast %cst_77 : f32 to vector<2x32xf32>
    %454 = arith.addf %453, %452 : vector<2x32xf32>
    %455 = arith.divf %453, %454 : vector<2x32xf32>
    %456 = vector.extract_strided_slice %443 {offsets = [0, 64], sizes = [2, 32], strides = [1, 1]} : vector<2x128xf32> to vector<2x32xf32>
    %457 = math.tanh %456 : vector<2x32xf32>
    %458 = vector.extract_strided_slice %443 {offsets = [0, 96], sizes = [2, 32], strides = [1, 1]} : vector<2x128xf32> to vector<2x32xf32>
    %459 = arith.negf %458 : vector<2x32xf32>
    %460 = math.exp %459 : vector<2x32xf32>
    %cst_78 = arith.constant 1.000000e+00 : f32
    %461 = vector.broadcast %cst_78 : f32 to vector<2x32xf32>
    %462 = arith.addf %461, %460 : vector<2x32xf32>
    %463 = arith.divf %461, %462 : vector<2x32xf32>
    %464 = arith.mulf %455, %409 : vector<2x32xf32>
    %465 = arith.mulf %449, %457 : vector<2x32xf32>
    %466 = arith.addf %464, %465 : vector<2x32xf32>
    %467 = math.tanh %466 : vector<2x32xf32>
    %468 = arith.mulf %463, %467 : vector<2x32xf32>
    %c0_79 = arith.constant 0 : index
    %c0_80 = arith.constant 0 : index
    %469 = vector.load %arg6[%c0_79, %c0_80] : memref<32x1xf32, #tpu.memory_space<vmem>>, vector<32x1xf32>
    %cst_81 = arith.constant dense<0.000000e+00> : vector<2x1xf32>
    %470 = tpu.matmul %468, %469, %cst_81 {dimension_numbers = #tpu.dot_dimension_numbers<[1], [0], [0], [1], [0, 0, 1, 1], [], []>} : vector<2x32xf32>, vector<32x1xf32>, vector<2x1xf32> -> vector<2x1xf32>
    %c0_82 = arith.constant 0 : index
    %c0_83 = arith.constant 0 : index
    %471 = vector.load %arg7[%c0_82, %c0_83] : memref<1x1xf32, #tpu.memory_space<vmem>>, vector<1x1xf32>
    %472 = vector.broadcast %471 : vector<1x1xf32> to vector<2x1xf32>
    %473 = arith.addf %470, %472 : vector<2x1xf32>
    %c0_84 = arith.constant 0 : index
    %c0_85 = arith.constant 0 : index
    %474 = vector.load %arg8[%c0_84, %c0_85] : memref<2x1xf32, #tpu.memory_space<vmem>>, vector<2x1xf32>
    tpu.vector_store %arg8[%c0_84, %c0_85], %473 {strides = array<i32>} : memref<2x1xf32, #tpu.memory_space<vmem>>, vector<2x1xf32>,
    return
  }
}

</mosaic_0001>

<bundles_post_ra>
// kernel: lstm_model_forward.1
= control target key start
LH: loop header
LB: loop body
LE: loop exit
PB: predicated region body
PF: predicated region fallthrough
CT: control target
= control target key end

     0   :  { %vm52_vm0 = vcmask 130048   ;;  %v1390_v7 = vmov 0.0   ;;  %s1391_s19 = smov 64   ;;  %vm82_vm5 = vcmask 261120   ;;  %vm152_vm6 = vcmask 523264   ;;  %s1811_s2 = inlined_call_operand.vmem [shape: f32[32,128], index: 2, kind: input, shape index: {}]   ;;  %s1812_s1 = inlined_call_operand.vmem [shape: f32[16,128], index: 1, kind: input, shape index: {}]   ;;  %s1813_s0 = inlined_call_operand.vmem [shape: f32[16,16], index: 0, kind: input, shape index: {}]   ;;  %s1814_s3 = inlined_call_operand.vmem [shape: f32[1,128], index: 3, kind: input, shape index: {}]   ;;  %s1815_s4 = inlined_call_operand.vmem [shape: f32[64,128], index: 4, kind: input, shape index: {}]   ;;  %s1816_s5 = inlined_call_operand.vmem [shape: f32[1,128], index: 5, kind: input, shape index: {}]   ;;  %s1817_s6 = inlined_call_operand.vmem [shape: f32[32,1], index: 6, kind: input, shape index: {}]   ;;  %s1818_s7 = inlined_call_operand.<no memory space> [shape: f32[1,1], index: 7, kind: input, shape index: {}]   ;;  %s1819_s8 = inlined_call_operand.vmem [shape: f32[2,1], index: 8, kind: output, shape index: {}]  }
   0x1   :  { %v1441_v0 = vld [vmem:[%s1811_s2 + $0x18] sm:$0xff]  ;;  %v32_v1 = vld [vmem:[%s1812_s1 + $0x8] sm:$0xff]  ;;  %v1449_v2 = vld [vmem:[%s1811_s2 + $0x10] sm:$0xff] }
   0x2   :  { %98 = vmatpush.msra.mxu1 %v1441_v0  ;;  %73 = vmatpush.msra.mxu0 %v32_v1  ;;  %v31_v3 = vld [vmem:[%s1812_s1] sm:$0xff]  ;;  %v1461_v5 = vld [vmem:[%s1811_s2 + $0x8] sm:$0xff]  ;;  %v1502_v33 = vld [vmem:[%s1815_s4 + $0x38] sm:$0xff] }
   0x3   :  { %v47_v4 = vld [vmem:[%s1813_s0] sm:$0xff]  ;;  %227 = vmatpush.msra.mxu3 %v1441_v0  ;;  %v1507_v34 = vld [vmem:[%s1815_s4 + $0x30] sm:$0xff]  ;;  %164 = vmatpush.msra.mxu2 %v1502_v33  ;;  %v1514_v35 = vld [vmem:[%s1815_s4 + $0x28] sm:$0xff] }
   0x4   :  { %99 = vmatpush.msra.mxu1 %v1449_v2  ;;  %74 = vmatpush.msra.mxu0 %v31_v3  ;;  %v1469_v6 = vld [vmem:[%s1811_s2] sm:$0xff]  ;;  %v1530_v37 = vld [vmem:[%s1815_s4 + $0x18] sm:$0xff]  ;;  %v1538_v38 = vld [vmem:[%s1815_s4 + $0x10] sm:$0xff] }
   0x5   :  { %1221 = vmatmul.msk.f32.vlgmr.msra.gmra.mxu0 %vm52_vm0, %v47_v4  ;;  %228 = vmatpush.msra.mxu3 %v1449_v2  ;;  %v1487_v8 = vld [vmem:[%s1814_s3] ss:$0 sm:$0xff]  ;;  %s1392_s3 = smov 32   ;;  %v1546_v39 = vld [vmem:[%s1815_s4 + $0x8] sm:$0xff] }
   0x6   :  { %100 = vmatpush.msra.mxu1 %v1461_v5  ;;  %301 = vmatpush.msrb.mxu0 %v1502_v33  ;;  %v1522_v36 = vld [vmem:[%s1815_s4 + $0x20] sm:$0xff] }
   0x7   :  { %229 = vmatpush.msra.mxu3 %v1461_v5  ;;  %165 = vmatpush.msra.mxu2 %v1507_v34  ;;  %v1559_v42 = vld [vmem:[%s1815_s4] sm:$0xff] }
   0x8   :  { %101 = vmatpush.msra.mxu1 %v1469_v6  ;;  %302 = vmatpush.msrb.mxu0 %v1507_v34  ;;  %v1590_v45 = vld [vmem:[%s1816_s5] ss:$0 sm:$0xff] }
   0x9   :  { %102 = vmatmul.f32.vlgmr.msra.gmra.mxu1 %v1390_v7  ;;  %230 = vmatpush.msra.mxu3 %v1469_v6 }
   0xa   :  { %367 = vmatpush.msrb.mxu1 %v1441_v0  ;;  %166 = vmatpush.msra.mxu2 %v1514_v35 }
   0xb   :  { %441 = vmatpush.msrb.mxu3 %v1502_v33  ;;  %303 = vmatpush.msrb.mxu0 %v1514_v35 }
   0xc   :  { %368 = vmatpush.msrb.mxu1 %v1449_v2  ;;  %167 = vmatpush.msra.mxu2 %v1522_v36 }
   0xd   :  { %442 = vmatpush.msrb.mxu3 %v1507_v34  ;;  %304 = vmatpush.msrb.mxu0 %v1522_v36 }
   0xe   :  { %369 = vmatpush.msrb.mxu1 %v1461_v5  ;;  %168 = vmatpush.msra.mxu2 %v1530_v37 }
   0xf   :  { %443 = vmatpush.msrb.mxu3 %v1514_v35  ;;  %305 = vmatpush.msrb.mxu0 %v1530_v37 }
  0x10   :  { %370 = vmatpush.msrb.mxu1 %v1469_v6  ;;  %169 = vmatpush.msra.mxu2 %v1538_v38 }
  0x11   :  { %444 = vmatpush.msrb.mxu3 %v1522_v36  ;;  %306 = vmatpush.msrb.mxu0 %v1538_v38 }
  0x12   :  { %507 = vmatpush.msra.mxu1 %v1441_v0  ;;  %170 = vmatpush.msra.mxu2 %v1546_v39 }
  0x13   :  { %445 = vmatpush.msrb.mxu3 %v1530_v37  ;;  %307 = vmatpush.msrb.mxu0 %v1546_v39 }
  0x14   :  { %508 = vmatpush.msra.mxu1 %v1449_v2  ;;  %171 = vmatpush.msra.mxu2 %v1559_v42 }
  0x15   :  { %446 = vmatpush.msrb.mxu3 %v1538_v38  ;;  %308 = vmatpush.msrb.mxu0 %v1559_v42 }
  0x16   :  { %509 = vmatpush.msra.mxu1 %v1461_v5  ;;  %581 = vmatpush.msrb.mxu2 %v1502_v33 }
  0x17   :  { %447 = vmatpush.msrb.mxu3 %v1546_v39  ;;  %647 = vmatpush.msra.mxu0 %v1441_v0 }
  0x18   :  { %510 = vmatpush.msra.mxu1 %v1469_v6  ;;  %582 = vmatpush.msrb.mxu2 %v1507_v34 }
  0x19   :  { %448 = vmatpush.msrb.mxu3 %v1559_v42  ;;  %648 = vmatpush.msra.mxu0 %v1449_v2 }
  0x1a   :  { %583 = vmatpush.msrb.mxu2 %v1514_v35 }
  0x1b   :  { %649 = vmatpush.msra.mxu0 %v1461_v5 }
  0x1c   :  { %584 = vmatpush.msrb.mxu2 %v1522_v36 }
  0x1d   :  { %650 = vmatpush.msra.mxu0 %v1469_v6 }
  0x1e   :  { %585 = vmatpush.msrb.mxu2 %v1530_v37 }
  0x20   :  { %586 = vmatpush.msrb.mxu2 %v1538_v38 }
  0x22   :  { %587 = vmatpush.msrb.mxu2 %v1546_v39 }
  0x24   :  { %588 = vmatpush.msrb.mxu2 %v1559_v42 }
  0x82   :  { %v76_v9 = vpop.f32.mrf.mxu0 }
  0x83   :  { %v1490_v10 = vadd.f32 %v1487_v8, %v76_v9 }
  0x86   :  { %v103_v11 = vpop.f32.mrf.mxu1 }
  0x87   :  { %v106_v12 = vadd.f32 %v103_v11, %v1490_v10 }
  0x89   :  { %1261 = vtanh.f32 %v106_v12  ;;  %v1223_v14 = vmul.f32 -1.442695, %v106_v12 }
  0x8b   :  { %1263 = vpow2.f32 %v1223_v14 }
  0x8f   :  { %v1262_v13 = vpop.eup %1261 }
  0x90   :  { %129 = vrot.lane.b32.xlu0 %v1262_v13, %s1391_s19 }
  0x91   :  { %v1264_v15 = vpop.eup %1263 }
  0x92   :  { %v110_v16 = vadd.f32 1.0, %v1264_v15 }
  0x94   :  { %1265 = vrcp.f32 %v110_v16  ;;  %v122_v22 = vand.u32 2147483648, %v110_v16  ;;  %vm116_vm2 = vweird.f32 %v110_v16  ;;  %v120_v23 = vand.u32 2147483647, %v110_v16 }
  0x96   :  { %v123_v25 = vor.u32 1.1754944e-38, %v122_v22  ;;  %vm121_vm4 = vcmp.eq.f32.partialorder %v120_v23, 8.507059e+37 }
  0x9a   :  { %v1266_v17 = vpop.eup %1265 }
  0x9b   :  { %v112_v18 = vmul.f32 %v1266_v17, %v110_v16  ;;  %vm117_vm1 = vweird.f32 %v1266_v17 }
  0x9c   :  { %vm118_vm3 = vmor %vm116_vm2, %vm117_vm1 }
  0x9d   :  { %v113_v19 = vsub.f32 1.0, %v112_v18 }
  0x9f   :  { %v114_v20 = vmul.f32 %v1266_v17, %v113_v19 }
  0xa1   :  { %v115_v21 = vadd.f32 %v1266_v17, %v114_v20 }
  0xa3   :  { %v119_v24 = vsel %vm118_vm3, %v1266_v17, %v115_v21 }
  0xa4   :  { %v124_v27 = vsel %vm121_vm4, %v123_v25, %v119_v24 }
  0xa5   :  { %v127_v29 = vmul.f32 0.0, %v124_v27 }
 0x102   :  { %v130_v26 = vpop.permute.xlu0 %129 }
 0x103   :  { %v132_v28 = vmul.f32 %v130_v26, %v124_v27 }
 0x105   :  { %134 = vrot.lane.b32.xlu0 %v132_v28, %s1392_s3 }
 0x177   :  { %v135_v30 = vpop.permute.xlu0 %134 }
 0x178   :  { %v1495_v31 = vadd.f32 %v135_v30, %v127_v29 }
 0x17a   :  { %1267 = vtanh.f32 %v1495_v31  ;;  %v260_v28 = vrot.slane %v1495_v31, 6 }
 0x180   :  { %v1268_v32 = vpop.eup %1267 }
 0x181   :  { %140 = vrot.lane.b32.xlu1 %v1268_v32, %s1391_s19 }
 0x1f3   :  { %v141_v40 = vpop.permute.xlu1 %140 }
 0x1f4   :  { %v143_v41 = vmul.f32 %v141_v40, %v124_v27 }
 0x1f6   :  { %145 = vrot.lane.b32.xlu1 %v143_v41, %s1392_s3 }
 0x268   :  { %v146_v43 = vpop.permute.xlu1 %145 }
 0x269   :  { %1226 = vmatmul.msk.f32.vlgmr.msra.gmra.mxu3 %vm82_vm5, %v146_v43  ;;  %v148_v44 = vsel %vm82_vm5, %v146_v43, 0.0 }
 0x26a   :  { %1224 = vmatmul.msk.f32.vlgmr.msra.gmra.mxu2 %vm152_vm6, %v148_v44  ;;  %779 = vmatpush.msra.mxu3 %v1441_v0 }
 0x26b   :  { %919 = vmatpush.msra.mxu2 %v1441_v0 }
 0x26c   :  { %780 = vmatpush.msra.mxu3 %v1449_v2 }
 0x26d   :  { %920 = vmatpush.msra.mxu2 %v1449_v2 }
 0x26e   :  { %781 = vmatpush.msra.mxu3 %v1461_v5 }
 0x26f   :  { %921 = vmatpush.msra.mxu2 %v1461_v5 }
 0x270   :  { %782 = vmatpush.msra.mxu3 %v1469_v6 }
 0x271   :  { %922 = vmatpush.msra.mxu2 %v1469_v6 }
 0x2ec   :  { %v232_v46 = vpop.f32.mrf.mxu3 }
 0x2ed   :  { %v173_v47 = vpop.f32.mrf.mxu2  ;;  %v236_v49 = vrot.slane %v232_v46, 6 }
 0x2ee   :  { %v174_v48 = vadd.f32 %v1590_v45, %v173_v47 }
 0x2ef   :  { %v238_v50 = vadd.f32 %v236_v49, %v1490_v10  ;;  %v48_v49 = vld [vmem:[%s1813_s0 + $0x8] sm:$0xff] }
 0x2f0   :  { %1269 = vtanh.f32 %v174_v48  ;;  %v1225_v53 = vmul.f32 -1.442695, %v174_v48  ;;  %1222 = vmatmul.msk.f32.gmra.mxu0 %vm52_vm0, %v48_v49 }
 0x2f1   :  { %1271 = vtanh.f32 %v238_v50  ;;  %v1227_v54 = vmul.f32 -1.442695, %v238_v50 }
 0x2f2   :  { %1273 = vpow2.f32 %v1225_v53 }
 0x2f3   :  { %1275 = vpow2.f32 %v1227_v54 }
 0x2f6   :  { %v1270_v51 = vpop.eup %1269 }
 0x2f7   :  { %198 = vrot.lane.b32.xlu2 %v1270_v51, %s1391_s19  ;;  %v1272_v52 = vpop.eup %1271 }
 0x2f8   :  { %v1274_v55 = vpop.eup %1273 }
 0x2f9   :  { %v179_v56 = vadd.f32 1.0, %v1274_v55  ;;  %v1276_v57 = vpop.eup %1275 }
 0x2fa   :  { %v242_v58 = vadd.f32 1.0, %v1276_v57 }
 0x2fb   :  { %1277 = vrcp.f32 %v179_v56  ;;  %v191_v7 = vand.u32 2147483648, %v179_v56  ;;  %vm185_vm8 = vweird.f32 %v179_v56  ;;  %v189_v9 = vand.u32 2147483647, %v179_v56 }
 0x2fc   :  { %1279 = vrcp.f32 %v242_v58  ;;  %v254_v18 = vand.u32 2147483648, %v242_v58  ;;  %vm248_vm12 = vweird.f32 %v242_v58  ;;  %v252_v19 = vand.u32 2147483647, %v242_v58 }
 0x2fd   :  { %v192_v13 = vor.u32 1.1754944e-38, %v191_v7  ;;  %vm190_vm10 = vcmp.eq.f32.partialorder %v189_v9, 8.507059e+37 }
 0x2fe   :  { %v255_v21 = vor.u32 1.1754944e-38, %v254_v18  ;;  %vm253_vm14 = vcmp.eq.f32.partialorder %v252_v19, 8.507059e+37 }
 0x2ff   :  { %264 = vrot.lane.b32.xlu2 %v1272_v52, %s1391_s19 }
 0x301   :  { %v1278_v59 = vpop.eup %1277 }
 0x302   :  { %v181_v60 = vmul.f32 %v1278_v59, %v179_v56  ;;  %v1280_v62 = vpop.eup %1279  ;;  %vm186_vm7 = vweird.f32 %v1278_v59 }
 0x303   :  { %v244_v1 = vmul.f32 %v1280_v62, %v242_v58  ;;  %vm187_vm9 = vmor %vm185_vm8, %vm186_vm7  ;;  %vm249_vm11 = vweird.f32 %v1280_v62 }
 0x304   :  { %v182_v61 = vsub.f32 1.0, %v181_v60  ;;  %vm250_vm13 = vmor %vm248_vm12, %vm249_vm11 }
 0x305   :  { %v245_v4 = vsub.f32 1.0, %v244_v1 }
 0x306   :  { %v183_v63 = vmul.f32 %v1278_v59, %v182_v61 }
 0x307   :  { %v246_v12 = vmul.f32 %v1280_v62, %v245_v4 }
 0x308   :  { %v184_v3 = vadd.f32 %v1278_v59, %v183_v63 }
 0x309   :  { %v247_v17 = vadd.f32 %v1280_v62, %v246_v12 }
 0x30a   :  { %v188_v11 = vsel %vm187_vm9, %v1278_v59, %v184_v3 }
 0x30b   :  { %v193_v15 = vsel %vm190_vm10, %v192_v13, %v188_v11  ;;  %v251_v20 = vsel %vm250_vm13, %v1280_v62, %v247_v17 }
 0x30c   :  { %v256_v22 = vsel %vm253_vm14, %v255_v21, %v251_v20  ;;  %v196_v25 = vmul.f32 0.0, %v193_v15 }
 0x30d   :  { %v262_v29 = vmul.f32 %v260_v28, %v256_v22 }
 0x351   :  { %v199_v14 = vpop.permute.xlu2 %198 }
 0x352   :  { %v201_v16 = vmul.f32 %v199_v14, %v193_v15 }
 0x354   :  { %203 = vrot.lane.b32.xlu0 %v201_v16, %s1392_s3 }
 0x359   :  { %v265_v23 = vpop.permute.xlu2 %264 }
 0x35a   :  { %v267_v24 = vmul.f32 %v265_v23, %v256_v22 }
 0x35c   :  { %269 = vrot.lane.b32.xlu1 %v267_v24, %s1392_s3 }
 0x36d   :  { %v1633_v55 = vpop.f32.mrf.mxu0 }
 0x3c6   :  { %v204_v26 = vpop.permute.xlu0 %203 }
 0x3c7   :  { %v1598_v27 = vadd.f32 %v204_v26, %v196_v25 }
 0x3c9   :  { %1281 = vtanh.f32 %v1598_v27 }
 0x3ce   :  { %v270_v30 = vpop.permute.xlu1 %269 }
 0x3cf   :  { %v1282_v32 = vpop.eup %1281  ;;  %v1602_v40 = vadd.f32 %v270_v30, %v262_v29 }
 0x3d0   :  { %209 = vrot.lane.b32.xlu2 %v1282_v32, %s1391_s19 }
 0x3d1   :  { %1283 = vtanh.f32 %v1602_v40 }
 0x3d7   :  { %v1284_v41 = vpop.eup %1283 }
 0x3d8   :  { %275 = vrot.lane.b32.xlu0 %v1284_v41, %s1391_s19 }
 0x42a   :  { %v210_v43 = vpop.permute.xlu2 %209 }
 0x42b   :  { %v212_v44 = vmul.f32 %v210_v43, %v193_v15 }
 0x42d   :  { %v284_v46 = vrot.slane %v212_v44, 6 }
 0x42f   :  { %285 = vrot.lane.b32.xlu2 %v284_v46, %s1391_s19 }
 0x44a   :  { %v276_v47 = vpop.permute.xlu0 %275 }
 0x44b   :  { %v278_v48 = vmul.f32 %v276_v47, %v256_v22  ;;  %v400_v47 = vrot.slane %v1602_v40, 6 }
 0x44d   :  { %v350_v31 = vrot.slane %v278_v48, 2  ;;  %280 = vrot.lane.b32.xlu1 %v278_v48, %s1392_s3 }
 0x44f   :  { %351 = vrot.lane.b32.xlu0 %v350_v31, %s1392_s3 }
 0x489   :  { %v286_v50 = vpop.permute.xlu2 %285 }
 0x4bf   :  { %v281_v51 = vpop.permute.xlu1 %280 }
 0x4c0   :  { %v288_v52 = vsel %vm82_vm5, %v281_v51, %v286_v50 }
 0x4c1   :  { %v290_v53 = vrot.slane %v288_v52, 2  ;;  %v352_v54 = vpop.permute.xlu0 %351 }
 0x4c2   :  { %1230 = vmatmul.msk.f32.vlgmr.msrb.gmra.mxu1 %vm82_vm5, %v352_v54 }
 0x4c3   :  { %1228 = vmatmul.msk.f32.vlgmr.msrb.gmra.mxu0 %vm152_vm6, %v290_v53  ;;  %716 = vmatpush.msrb.mxu1 %v1502_v33 }
 0x4c4   :  { %853 = vmatpush.msrb.mxu0 %v1502_v33 }
 0x4c5   :  { %717 = vmatpush.msrb.mxu1 %v1507_v34 }
 0x4c6   :  { %854 = vmatpush.msrb.mxu0 %v1507_v34 }
 0x4c7   :  { %718 = vmatpush.msrb.mxu1 %v1514_v35 }
 0x4c8   :  { %855 = vmatpush.msrb.mxu0 %v1514_v35 }
 0x4c9   :  { %719 = vmatpush.msrb.mxu1 %v1522_v36 }
 0x4ca   :  { %856 = vmatpush.msrb.mxu0 %v1522_v36 }
 0x4cb   :  { %720 = vmatpush.msrb.mxu1 %v1530_v37 }
 0x4cc   :  { %857 = vmatpush.msrb.mxu0 %v1530_v37 }
 0x4cd   :  { %721 = vmatpush.msrb.mxu1 %v1538_v38 }
 0x4ce   :  { %858 = vmatpush.msrb.mxu0 %v1538_v38 }
 0x4cf   :  { %722 = vmatpush.msrb.mxu1 %v1546_v39 }
 0x4d0   :  { %859 = vmatpush.msrb.mxu0 %v1546_v39 }
 0x4d1   :  { %723 = vmatpush.msrb.mxu1 %v1559_v42 }
 0x4d2   :  { %860 = vmatpush.msrb.mxu0 %v1559_v42 }
 0x53f   :  { %v372_v56 = vpop.f32.mrf.mxu1 }
 0x540   :  { %v376_v57 = vrot.slane %v372_v56, 4  ;;  %v310_v58 = vpop.f32.mrf.mxu0 }
 0x541   :  { %v311_v59 = vadd.f32 %v1590_v45, %v310_v58 }
 0x542   :  { %v378_v60 = vadd.f32 %v376_v57, %v1490_v10 }
 0x543   :  { %1285 = vtanh.f32 %v311_v59  ;;  %v1229_v7 = vmul.f32 -1.442695, %v311_v59 }
 0x544   :  { %1287 = vtanh.f32 %v378_v60  ;;  %v1231_v63 = vmul.f32 -1.442695, %v378_v60 }
 0x546   :  { %1289 = vpow2.f32 %v1231_v63 }
 0x549   :  { %v1286_v61 = vpop.eup %1285 }
 0x54a   :  { %v1288_v62 = vpop.eup %1287  ;;  %335 = vrot.lane.b32.xlu1 %v1286_v61, %s1391_s19 }
 0x54b   :  { %404 = vrot.lane.b32.xlu2 %v1288_v62, %s1391_s19 }
 0x54c   :  { %v1290_v1 = vpop.eup %1289 }
 0x54d   :  { %v382_v3 = vadd.f32 1.0, %v1290_v1 }
 0x54f   :  { %1291 = vrcp.f32 %v382_v3  ;;  %v394_v16 = vand.u32 2147483648, %v382_v3  ;;  %vm388_vm0 = vweird.f32 %v382_v3  ;;  %v392_v17 = vand.u32 2147483647, %v382_v3 }
 0x550   :  { %1293 = vpow2.f32 %v1229_v7 }
 0x551   :  { %v395_v19 = vor.u32 1.1754944e-38, %v394_v16  ;;  %vm393_vm2 = vcmp.eq.f32.partialorder %v392_v17, 8.507059e+37 }
 0x555   :  { %v1292_v4 = vpop.eup %1291 }
 0x556   :  { %v384_v9 = vmul.f32 %v1292_v4, %v382_v3  ;;  %v1294_v12 = vpop.eup %1293  ;;  %vm389_vm15 = vweird.f32 %v1292_v4 }
 0x557   :  { %v316_v14 = vadd.f32 1.0, %v1294_v12  ;;  %vm390_vm1 = vmor %vm388_vm0, %vm389_vm15 }
 0x558   :  { %v385_v11 = vsub.f32 1.0, %v384_v9 }
 0x559   :  { %1295 = vrcp.f32 %v316_v14  ;;  %v328_v29 = vand.u32 2147483648, %v316_v14  ;;  %vm322_vm4 = vweird.f32 %v316_v14  ;;  %v326_v30 = vand.u32 2147483647, %v316_v14 }
 0x55a   :  { %v386_v13 = vmul.f32 %v1292_v4, %v385_v11 }
 0x55b   :  { %v329_v41 = vor.u32 1.1754944e-38, %v328_v29  ;;  %vm327_vm8 = vcmp.eq.f32.partialorder %v326_v30, 8.507059e+37 }
 0x55c   :  { %v387_v15 = vadd.f32 %v1292_v4, %v386_v13 }
 0x55e   :  { %v391_v18 = vsel %vm390_vm1, %v1292_v4, %v387_v15 }
 0x55f   :  { %v396_v20 = vsel %vm393_vm2, %v395_v19, %v391_v18  ;;  %v1296_v22 = vpop.eup %1295 }
 0x560   :  { %v318_v24 = vmul.f32 %v1296_v22, %v316_v14  ;;  %vm323_vm3 = vweird.f32 %v1296_v22  ;;  %v402_v48 = vmul.f32 %v400_v47, %v396_v20 }
 0x561   :  { %vm324_vm7 = vmor %vm322_vm4, %vm323_vm3 }
 0x562   :  { %v319_v25 = vsub.f32 1.0, %v318_v24 }
 0x564   :  { %v320_v26 = vmul.f32 %v1296_v22, %v319_v25 }
 0x566   :  { %v321_v28 = vadd.f32 %v1296_v22, %v320_v26 }
 0x568   :  { %v325_v32 = vsel %vm324_vm7, %v1296_v22, %v321_v28 }
 0x569   :  { %v330_v44 = vsel %vm327_vm8, %v329_v41, %v325_v32 }
 0x56a   :  { %v333_v51 = vmul.f32 %v330_v44, %v1598_v27 }
 0x5a5   :  { %v405_v21 = vpop.permute.xlu2 %404 }
 0x5a6   :  { %v407_v23 = vmul.f32 %v405_v21, %v396_v20 }
 0x5a8   :  { %409 = vrot.lane.b32.xlu1 %v407_v23, %s1392_s3 }
 0x5bc   :  { %v336_v43 = vpop.permute.xlu1 %335 }
 0x5bd   :  { %v338_v46 = vmul.f32 %v336_v43, %v330_v44 }
 0x5bf   :  { %340 = vrot.lane.b32.xlu0 %v338_v46, %s1392_s3 }
 0x61a   :  { %v410_v31 = vpop.permute.xlu1 %409 }
 0x61b   :  { %v1642_v49 = vadd.f32 %v410_v31, %v402_v48 }
 0x61d   :  { %1297 = vtanh.f32 %v1642_v49 }
 0x623   :  { %v1298_v50 = vpop.eup %1297 }
 0x624   :  { %415 = vrot.lane.b32.xlu0 %v1298_v50, %s1391_s19 }
 0x631   :  { %v341_v52 = vpop.permute.xlu0 %340 }
 0x632   :  { %v1647_v53 = vadd.f32 %v341_v52, %v333_v51 }
 0x634   :  { %1299 = vtanh.f32 %v1647_v53 }
 0x63a   :  { %v1300_v54 = vpop.eup %1299 }
 0x63b   :  { %346 = vrot.lane.b32.xlu2 %v1300_v54, %s1391_s19 }
 0x695   :  { %v347_v40 = vpop.permute.xlu2 %346 }
 0x696   :  { %v349_v56 = vmul.f32 %v347_v40, %v330_v44  ;;  %v416_v57 = vpop.permute.xlu0 %415 }
 0x697   :  { %v418_v58 = vmul.f32 %v416_v57, %v396_v20 }
 0x698   :  { %v424_v59 = vrot.slane %v349_v56, 4  ;;  %v540_v56 = vrot.slane %v1642_v49, 6 }
 0x699   :  { %v490_v60 = vrot.slane %v418_v58, 4  ;;  %420 = vrot.lane.b32.xlu1 %v418_v58, %s1392_s3 }
 0x69a   :  { %425 = vrot.lane.b32.xlu2 %v424_v59, %s1391_s19 }
 0x69b   :  { %491 = vrot.lane.b32.xlu0 %v490_v60, %s1392_s3 }
 0x6f4   :  { %v426_v27 = vpop.permute.xlu2 %425 }
 0x70b   :  { %v421_v61 = vpop.permute.xlu1 %420 }
 0x70c   :  { %v428_v62 = vsel %vm82_vm5, %v421_v61, %v426_v27 }
 0x70d   :  { %v430_v63 = vrot.slane %v428_v62, 4  ;;  %v492_v1 = vpop.permute.xlu0 %491 }
 0x70e   :  { %1234 = vmatmul.msk.f32.vlgmr.msra.gmra.mxu1 %vm82_vm5, %v492_v1 }
 0x70f   :  { %1232 = vmatmul.msk.f32.vlgmr.msrb.gmra.mxu3 %vm152_vm6, %v430_v63  ;;  %1059 = vmatpush.msra.mxu1 %v1441_v0 }
 0x710   :  { %993 = vmatpush.msrb.mxu3 %v1502_v33 }
 0x711   :  { %1060 = vmatpush.msra.mxu1 %v1449_v2 }
 0x712   :  { %994 = vmatpush.msrb.mxu3 %v1507_v34 }
 0x713   :  { %1061 = vmatpush.msra.mxu1 %v1461_v5 }
 0x714   :  { %995 = vmatpush.msrb.mxu3 %v1514_v35 }
 0x715   :  { %1062 = vmatpush.msra.mxu1 %v1469_v6 }
 0x716   :  { %996 = vmatpush.msrb.mxu3 %v1522_v36 }
 0x718   :  { %997 = vmatpush.msrb.mxu3 %v1530_v37 }
 0x71a   :  { %998 = vmatpush.msrb.mxu3 %v1538_v38 }
 0x71c   :  { %999 = vmatpush.msrb.mxu3 %v1546_v39 }
 0x71e   :  { %1000 = vmatpush.msrb.mxu3 %v1559_v42 }
 0x78b   :  { %v512_v0 = vpop.f32.mrf.mxu1 }
 0x78c   :  { %v516_v2 = vrot.slane %v512_v0, 2 }
 0x78e   :  { %v518_v3 = vadd.f32 %v516_v2, %v1490_v10 }
 0x790   :  { %1301 = vtanh.f32 %v518_v3  ;;  %v1235_v13 = vmul.f32 -1.442695, %v518_v3 }
 0x792   :  { %v450_v5 = vpop.f32.mrf.mxu3 }
 0x793   :  { %v451_v4 = vadd.f32 %v1590_v45, %v450_v5 }
 0x795   :  { %1303 = vtanh.f32 %v451_v4  ;;  %v1233_v9 = vmul.f32 -1.442695, %v451_v4  ;;  %v1701_v4 = vadd.f32 %v1487_v8, %v1633_v55 }
 0x796   :  { %v1302_v6 = vpop.eup %1301 }
 0x797   :  { %544 = vrot.lane.b32.xlu1 %v1302_v6, %s1391_s19  ;;  %1305 = vpow2.f32 %v1233_v9 }
 0x79b   :  { %v1304_v7 = vpop.eup %1303 }
 0x79c   :  { %475 = vrot.lane.b32.xlu2 %v1304_v7, %s1391_s19 }
 0x79d   :  { %v1306_v11 = vpop.eup %1305 }
 0x79e   :  { %v456_v12 = vadd.f32 1.0, %v1306_v11 }
 0x7a0   :  { %1307 = vrcp.f32 %v456_v12  ;;  %v468_v20 = vand.u32 2147483648, %v456_v12  ;;  %vm462_vm10 = vweird.f32 %v456_v12  ;;  %v466_v21 = vand.u32 2147483647, %v456_v12 }
 0x7a1   :  { %1309 = vpow2.f32 %v1235_v13 }
 0x7a2   :  { %v469_v24 = vor.u32 1.1754944e-38, %v468_v20  ;;  %vm467_vm12 = vcmp.eq.f32.partialorder %v466_v21, 8.507059e+37 }
 0x7a6   :  { %v1308_v14 = vpop.eup %1307 }
 0x7a7   :  { %v458_v10 = vmul.f32 %v1308_v14, %v456_v12  ;;  %v1310_v15 = vpop.eup %1309  ;;  %vm463_vm9 = vweird.f32 %v1308_v14 }
 0x7a8   :  { %v522_v17 = vadd.f32 1.0, %v1310_v15  ;;  %vm464_vm11 = vmor %vm462_vm10, %vm463_vm9 }
 0x7a9   :  { %v459_v16 = vsub.f32 1.0, %v458_v10 }
 0x7aa   :  { %1311 = vrcp.f32 %v522_v17  ;;  %v534_v43 = vand.u32 2147483648, %v522_v17  ;;  %vm528_vm14 = vweird.f32 %v522_v17  ;;  %v532_v44 = vand.u32 2147483647, %v522_v17 }
 0x7ab   :  { %v460_v18 = vmul.f32 %v1308_v14, %v459_v16 }
 0x7ac   :  { %v535_v47 = vor.u32 1.1754944e-38, %v534_v43  ;;  %vm533_vm0 = vcmp.eq.f32.partialorder %v532_v44, 8.507059e+37 }
 0x7ad   :  { %v461_v19 = vadd.f32 %v1308_v14, %v460_v18 }
 0x7af   :  { %v465_v23 = vsel %vm464_vm11, %v1308_v14, %v461_v19 }
 0x7b0   :  { %v1312_v22 = vpop.eup %1311  ;;  %v470_v26 = vsel %vm467_vm12, %v469_v24, %v465_v23 }
 0x7b1   :  { %v524_v28 = vmul.f32 %v1312_v22, %v522_v17  ;;  %vm529_vm13 = vweird.f32 %v1312_v22  ;;  %v473_v51 = vmul.f32 %v470_v26, %v1647_v53 }
 0x7b2   :  { %vm530_vm15 = vmor %vm528_vm14, %vm529_vm13 }
 0x7b3   :  { %v525_v30 = vsub.f32 1.0, %v524_v28 }
 0x7b5   :  { %v526_v32 = vmul.f32 %v1312_v22, %v525_v30 }
 0x7b7   :  { %v527_v41 = vadd.f32 %v1312_v22, %v526_v32 }
 0x7b9   :  { %v531_v46 = vsel %vm530_vm15, %v1312_v22, %v527_v41 }
 0x7ba   :  { %v536_v31 = vsel %vm533_vm0, %v535_v47, %v531_v46 }
 0x7bb   :  { %v542_v57 = vmul.f32 %v540_v56, %v536_v31 }
 0x7f6   :  { %v476_v25 = vpop.permute.xlu2 %475 }
 0x7f7   :  { %v478_v29 = vmul.f32 %v476_v25, %v470_v26 }
 0x7f9   :  { %480 = vrot.lane.b32.xlu1 %v478_v29, %s1392_s3 }
 0x809   :  { %v545_v48 = vpop.permute.xlu1 %544 }
 0x80a   :  { %v547_v50 = vmul.f32 %v545_v48, %v536_v31 }
 0x80c   :  { %549 = vrot.lane.b32.xlu0 %v547_v50, %s1392_s3 }
 0x86b   :  { %v481_v52 = vpop.permute.xlu1 %480 }
 0x86c   :  { %v1676_v54 = vadd.f32 %v481_v52, %v473_v51 }
 0x86e   :  { %1313 = vtanh.f32 %v1676_v54 }
 0x874   :  { %v1314_v40 = vpop.eup %1313 }
 0x875   :  { %486 = vrot.lane.b32.xlu0 %v1314_v40, %s1391_s19 }
 0x87e   :  { %v550_v58 = vpop.permute.xlu0 %549 }
 0x87f   :  { %v1681_v59 = vadd.f32 %v550_v58, %v542_v57 }
 0x881   :  { %1315 = vtanh.f32 %v1681_v59  ;;  %v677_v48 = vrot.slane %v1681_v59, 6 }
 0x887   :  { %v1316_v60 = vpop.eup %1315 }
 0x888   :  { %555 = vrot.lane.b32.xlu2 %v1316_v60, %s1391_s19 }
 0x8e2   :  { %v556_v53 = vpop.permute.xlu2 %555 }
 0x8e3   :  { %v558_v27 = vmul.f32 %v556_v53, %v536_v31 }
 0x8e5   :  { %v630_v61 = vrot.slane %v558_v27, 6  ;;  %560 = vrot.lane.b32.xlu2 %v558_v27, %s1392_s3 }
 0x8e7   :  { %631 = vrot.lane.b32.xlu1 %v630_v61, %s1392_s3  ;;  %v487_v62 = vpop.permute.xlu0 %486 }
 0x8e8   :  { %v489_v63 = vmul.f32 %v487_v62, %v470_v26 }
 0x8ea   :  { %v564_v1 = vrot.slane %v489_v63, 2 }
 0x8ec   :  { %565 = vrot.lane.b32.xlu0 %v564_v1, %s1391_s19 }
 0x93f   :  { %v561_v0 = vpop.permute.xlu2 %560 }
 0x959   :  { %v632_v49 = vpop.permute.xlu1 %631 }
 0x95a   :  { %1238 = vmatmul.msk.f32.vlgmr.msra.gmra.mxu0 %vm82_vm5, %v632_v49 }
 0x95e   :  { %v566_v2 = vpop.permute.xlu0 %565 }
 0x95f   :  { %v568_v3 = vsel %vm82_vm5, %v561_v0, %v566_v2 }
 0x960   :  { %v570_v5 = vrot.slane %v568_v3, 6 }
 0x962   :  { %1236 = vmatmul.msk.f32.vlgmr.msrb.gmra.mxu2 %vm152_vm6, %v570_v5 }
 0x963   :  { %1133 = vmatpush.msrb.mxu2 %v1502_v33 }
 0x965   :  { %1134 = vmatpush.msrb.mxu2 %v1507_v34 }
 0x967   :  { %1135 = vmatpush.msrb.mxu2 %v1514_v35 }
 0x969   :  { %1136 = vmatpush.msrb.mxu2 %v1522_v36 }
 0x96b   :  { %1137 = vmatpush.msrb.mxu2 %v1530_v37 }
 0x96d   :  { %1138 = vmatpush.msrb.mxu2 %v1538_v38 }
 0x96f   :  { %1139 = vmatpush.msrb.mxu2 %v1546_v39 }
 0x971   :  { %1140 = vmatpush.msrb.mxu2 %v1559_v42 }
 0x9d7   :  { %v652_v6 = vpop.f32.mrf.mxu0 }
 0x9d8   :  { %v655_v33 = vadd.f32 %v652_v6, %v1701_v4 }
 0x9da   :  { %1317 = vtanh.f32 %v655_v33  ;;  %v1239_v42 = vmul.f32 -1.442695, %v655_v33 }
 0x9e0   :  { %v1318_v34 = vpop.eup %1317 }
 0x9e1   :  { %681 = vrot.lane.b32.xlu1 %v1318_v34, %s1391_s19 }
 0x9e5   :  { %v590_v35 = vpop.f32.mrf.mxu2 }
 0x9e6   :  { %v591_v36 = vadd.f32 %v1590_v45, %v590_v35 }
 0x9e8   :  { %1319 = vtanh.f32 %v591_v36  ;;  %v1237_v38 = vmul.f32 -1.442695, %v591_v36 }
 0x9ea   :  { %1321 = vpow2.f32 %v1237_v38 }
 0x9eb   :  { %1323 = vpow2.f32 %v1239_v42 }
 0x9ee   :  { %v1320_v37 = vpop.eup %1319 }
 0x9ef   :  { %615 = vrot.lane.b32.xlu2 %v1320_v37, %s1391_s19 }
 0x9f0   :  { %v1322_v39 = vpop.eup %1321 }
 0x9f1   :  { %v596_v8 = vadd.f32 1.0, %v1322_v39  ;;  %v1324_v55 = vpop.eup %1323 }
 0x9f2   :  { %v659_v9 = vadd.f32 1.0, %v1324_v55 }
 0x9f3   :  { %1325 = vrcp.f32 %v596_v8  ;;  %v608_v16 = vand.u32 2147483648, %v596_v8  ;;  %vm602_vm2 = vweird.f32 %v596_v8  ;;  %v606_v17 = vand.u32 2147483647, %v596_v8 }
 0x9f4   :  { %1327 = vrcp.f32 %v659_v9  ;;  %v671_v26 = vand.u32 2147483648, %v659_v9  ;;  %vm665_vm8 = vweird.f32 %v659_v9  ;;  %v669_v28 = vand.u32 2147483647, %v659_v9 }
 0x9f5   :  { %v609_v20 = vor.u32 1.1754944e-38, %v608_v16  ;;  %vm607_vm4 = vcmp.eq.f32.partialorder %v606_v17, 8.507059e+37 }
 0x9f6   :  { %v672_v30 = vor.u32 1.1754944e-38, %v671_v26  ;;  %vm670_vm10 = vcmp.eq.f32.partialorder %v669_v28, 8.507059e+37 }
 0x9f9   :  { %v1326_v7 = vpop.eup %1325 }
 0x9fa   :  { %v598_v11 = vmul.f32 %v1326_v7, %v596_v8  ;;  %v1328_v13 = vpop.eup %1327  ;;  %vm603_vm1 = vweird.f32 %v1326_v7 }
 0x9fb   :  { %v661_v10 = vmul.f32 %v1328_v13, %v659_v9  ;;  %vm604_vm3 = vmor %vm602_vm2, %vm603_vm1  ;;  %vm666_vm7 = vweird.f32 %v1328_v13 }
 0x9fc   :  { %v599_v12 = vsub.f32 1.0, %v598_v11  ;;  %vm667_vm9 = vmor %vm665_vm8, %vm666_vm7 }
 0x9fd   :  { %v662_v18 = vsub.f32 1.0, %v661_v10 }
 0x9fe   :  { %v600_v14 = vmul.f32 %v1326_v7, %v599_v12 }
 0x9ff   :  { %v663_v21 = vmul.f32 %v1328_v13, %v662_v18 }
 0xa00   :  { %v601_v15 = vadd.f32 %v1326_v7, %v600_v14 }
 0xa01   :  { %v664_v25 = vadd.f32 %v1328_v13, %v663_v21 }
 0xa02   :  { %v605_v19 = vsel %vm604_vm3, %v1326_v7, %v601_v15 }
 0xa03   :  { %v610_v23 = vsel %vm607_vm4, %v609_v20, %v605_v19  ;;  %v668_v29 = vsel %vm667_vm9, %v1328_v13, %v664_v25 }
 0xa04   :  { %v673_v41 = vsel %vm670_vm10, %v672_v30, %v668_v29  ;;  %v613_v44 = vmul.f32 %v610_v23, %v1676_v54 }
 0xa05   :  { %v679_v50 = vmul.f32 %v677_v48, %v673_v41 }
 0xa49   :  { %v616_v22 = vpop.permute.xlu2 %615 }
 0xa4a   :  { %v618_v24 = vmul.f32 %v616_v22, %v610_v23 }
 0xa4c   :  { %620 = vrot.lane.b32.xlu1 %v618_v24, %s1392_s3 }
 0xa53   :  { %v682_v32 = vpop.permute.xlu1 %681 }
 0xa54   :  { %v684_v43 = vmul.f32 %v682_v32, %v673_v41 }
 0xa56   :  { %686 = vrot.lane.b32.xlu0 %v684_v43, %s1392_s3 }
 0xabe   :  { %v621_v46 = vpop.permute.xlu1 %620 }
 0xabf   :  { %v1710_v47 = vadd.f32 %v621_v46, %v613_v44 }
 0xac1   :  { %1329 = vtanh.f32 %v1710_v47 }
 0xac7   :  { %v1330_v31 = vpop.eup %1329 }
 0xac8   :  { %626 = vrot.lane.b32.xlu0 %v1330_v31, %s1391_s19  ;;  %v687_v51 = vpop.permute.xlu0 %686 }
 0xac9   :  { %v1715_v52 = vadd.f32 %v687_v51, %v679_v50 }
 0xacb   :  { %1331 = vtanh.f32 %v1715_v52  ;;  %v812_v24 = vrot.slane %v1715_v52, 6 }
 0xad1   :  { %v1332_v40 = vpop.eup %1331 }
 0xad2   :  { %692 = vrot.lane.b32.xlu2 %v1332_v40, %s1391_s19 }
 0xb2c   :  { %v693_v54 = vpop.permute.xlu2 %692 }
 0xb2d   :  { %v695_v56 = vmul.f32 %v693_v54, %v673_v41 }
 0xb2f   :  { %697 = vrot.lane.b32.xlu1 %v695_v56, %s1392_s3 }
 0xb3a   :  { %v627_v57 = vpop.permute.xlu0 %626 }
 0xb3b   :  { %v629_v58 = vmul.f32 %v627_v57, %v610_v23 }
 0xb3d   :  { %701 = vrot.lane.b32.xlu2 %v629_v58, %s1391_s19 }
 0xb97   :  { %v702_v59 = vpop.permute.xlu2 %701 }
 0xba1   :  { %v698_v60 = vpop.permute.xlu1 %697 }
 0xba2   :  { %v704_v53 = vsel %vm82_vm5, %v698_v60, %v702_v59  ;;  %1242 = vmatmul.msk.f32.vlgmr.msra.gmra.mxu3 %vm82_vm5, %v698_v60 }
 0xba3   :  { %1240 = vmatmul.msk.f32.vlgmr.msrb.gmra.mxu1 %vm152_vm6, %v704_v53 }
 0xc20   :  { %v725_v27 = vpop.f32.mrf.mxu1 }
 0xc21   :  { %v726_v61 = vadd.f32 %v1590_v45, %v725_v27 }
 0xc23   :  { %1333 = vtanh.f32 %v726_v61  ;;  %v1241_v2 = vmul.f32 -1.442695, %v726_v61 }
 0xc25   :  { %v784_v62 = vpop.f32.mrf.mxu3 }
 0xc26   :  { %v788_v63 = vrot.slane %v784_v62, 6 }
 0xc28   :  { %v790_v1 = vadd.f32 %v788_v63, %v1701_v4 }
 0xc29   :  { %v1334_v49 = vpop.eup %1333 }
 0xc2a   :  { %1335 = vtanh.f32 %v790_v1  ;;  %750 = vrot.lane.b32.xlu1 %v1334_v49, %s1391_s19  ;;  %v1243_v3 = vmul.f32 -1.442695, %v790_v1 }
 0xc2b   :  { %1337 = vpow2.f32 %v1241_v2 }
 0xc2c   :  { %1339 = vpow2.f32 %v1243_v3 }
 0xc30   :  { %v1336_v0 = vpop.eup %1335 }
 0xc31   :  { %816 = vrot.lane.b32.xlu0 %v1336_v0, %s1391_s19  ;;  %v1338_v5 = vpop.eup %1337 }
 0xc32   :  { %v731_v6 = vadd.f32 1.0, %v1338_v5  ;;  %v1340_v33 = vpop.eup %1339 }
 0xc33   :  { %v794_v34 = vadd.f32 1.0, %v1340_v33 }
 0xc34   :  { %1341 = vrcp.f32 %v731_v6  ;;  %v743_v7 = vand.u32 2147483648, %v731_v6  ;;  %vm737_vm12 = vweird.f32 %v731_v6  ;;  %v741_v9 = vand.u32 2147483647, %v731_v6 }
 0xc35   :  { %1343 = vrcp.f32 %v794_v34  ;;  %v806_v17 = vand.u32 2147483648, %v794_v34  ;;  %vm800_vm0 = vweird.f32 %v794_v34  ;;  %v804_v18 = vand.u32 2147483647, %v794_v34 }
 0xc36   :  { %v744_v13 = vor.u32 1.1754944e-38, %v743_v7  ;;  %vm742_vm14 = vcmp.eq.f32.partialorder %v741_v9, 8.507059e+37 }
 0xc37   :  { %v807_v20 = vor.u32 1.1754944e-38, %v806_v17  ;;  %vm805_vm2 = vcmp.eq.f32.partialorder %v804_v18, 8.507059e+37 }
 0xc3a   :  { %v1342_v35 = vpop.eup %1341 }
 0xc3b   :  { %v733_v36 = vmul.f32 %v1342_v35, %v731_v6  ;;  %v1344_v37 = vpop.eup %1343  ;;  %vm738_vm11 = vweird.f32 %v1342_v35 }
 0xc3c   :  { %v796_v39 = vmul.f32 %v1344_v37, %v794_v34  ;;  %vm739_vm13 = vmor %vm737_vm12, %vm738_vm11  ;;  %vm801_vm15 = vweird.f32 %v1344_v37 }
 0xc3d   :  { %v734_v38 = vsub.f32 1.0, %v733_v36  ;;  %vm802_vm1 = vmor %vm800_vm0, %vm801_vm15 }
 0xc3e   :  { %v797_v8 = vsub.f32 1.0, %v796_v39 }
 0xc3f   :  { %v735_v42 = vmul.f32 %v1342_v35, %v734_v38 }
 0xc40   :  { %v798_v11 = vmul.f32 %v1344_v37, %v797_v8 }
 0xc41   :  { %v736_v55 = vadd.f32 %v1342_v35, %v735_v42 }
 0xc42   :  { %v799_v15 = vadd.f32 %v1344_v37, %v798_v11 }
 0xc43   :  { %v740_v12 = vsel %vm739_vm13, %v1342_v35, %v736_v55 }
 0xc44   :  { %v745_v10 = vsel %vm742_vm14, %v744_v13, %v740_v12  ;;  %v803_v19 = vsel %vm802_vm1, %v1344_v37, %v799_v15 }
 0xc45   :  { %v808_v21 = vsel %vm805_vm2, %v807_v20, %v803_v19  ;;  %v748_v30 = vmul.f32 %v745_v10, %v1710_v47 }
 0xc46   :  { %v814_v25 = vmul.f32 %v812_v24, %v808_v21 }
 0xc9c   :  { %v751_v14 = vpop.permute.xlu1 %750 }
 0xc9d   :  { %v753_v16 = vmul.f32 %v751_v14, %v745_v10 }
 0xc9f   :  { %755 = vrot.lane.b32.xlu0 %v753_v16, %s1392_s3 }
 0xca3   :  { %v817_v22 = vpop.permute.xlu0 %816 }
 0xca4   :  { %v819_v23 = vmul.f32 %v817_v22, %v808_v21 }
 0xca6   :  { %821 = vrot.lane.b32.xlu2 %v819_v23, %s1392_s3 }
 0xd00   :  { %v822_v26 = vpop.permute.xlu2 %821 }
 0xd01   :  { %v1731_v28 = vadd.f32 %v822_v26, %v814_v25 }
 0xd03   :  { %1345 = vtanh.f32 %v1731_v28  ;;  %v952_v22 = vrot.slane %v1731_v28, 6 }
 0xd09   :  { %v1346_v29 = vpop.eup %1345 }
 0xd0a   :  { %827 = vrot.lane.b32.xlu1 %v1346_v29, %s1391_s19 }
 0xd11   :  { %v756_v32 = vpop.permute.xlu0 %755 }
 0xd12   :  { %v1736_v41 = vadd.f32 %v756_v32, %v748_v30 }
 0xd14   :  { %1347 = vtanh.f32 %v1736_v41 }
 0xd1a   :  { %v1348_v43 = vpop.eup %1347 }
 0xd1b   :  { %761 = vrot.lane.b32.xlu2 %v1348_v43, %s1391_s19 }
 0xd75   :  { %v762_v44 = vpop.permute.xlu2 %761 }
 0xd76   :  { %v764_v46 = vmul.f32 %v762_v44, %v745_v10 }
 0xd78   :  { %v836_v48 = vrot.slane %v764_v46, 6 }
 0xd7a   :  { %837 = vrot.lane.b32.xlu2 %v836_v48, %s1391_s19 }
 0xd7c   :  { %v828_v31 = vpop.permute.xlu1 %827 }
 0xd7d   :  { %v830_v50 = vmul.f32 %v828_v31, %v808_v21 }
 0xd7f   :  { %v902_v51 = vrot.slane %v830_v50, 2  ;;  %832 = vrot.lane.b32.xlu1 %v830_v50, %s1392_s3 }
 0xd81   :  { %903 = vrot.lane.b32.xlu0 %v902_v51, %s1392_s3 }
 0xdd4   :  { %v838_v47 = vpop.permute.xlu2 %837 }
 0xdf1   :  { %v833_v52 = vpop.permute.xlu1 %832 }
 0xdf2   :  { %v840_v40 = vsel %vm82_vm5, %v833_v52, %v838_v47 }
 0xdf3   :  { %v842_v54 = vrot.slane %v840_v40, 2  ;;  %v904_v56 = vpop.permute.xlu0 %903 }
 0xdf4   :  { %1246 = vmatmul.msk.f32.vlgmr.msra.gmra.mxu2 %vm82_vm5, %v904_v56  ;;  %v1773_v56 = vld [vmem:[%s1816_s5] ss:$0 sm:$0xff] }
 0xdf5   :  { %1244 = vmatmul.msk.f32.vlgmr.msrb.gmra.mxu0 %vm152_vm6, %v842_v54 }
 0xe72   :  { %v862_v57 = vpop.f32.mrf.mxu0 }
 0xe73   :  { %v863_v58 = vadd.f32 %v1590_v45, %v862_v57 }
 0xe75   :  { %1349 = vtanh.f32 %v863_v58  ;;  %v1245_v62 = vmul.f32 -1.442695, %v863_v58 }
 0xe77   :  { %v924_v59 = vpop.f32.mrf.mxu2 }
 0xe78   :  { %v928_v60 = vrot.slane %v924_v59, 4 }
 0xe7a   :  { %v930_v53 = vadd.f32 %v928_v60, %v1701_v4 }
 0xe7b   :  { %v1350_v27 = vpop.eup %1349 }
 0xe7c   :  { %1351 = vtanh.f32 %v930_v53  ;;  %887 = vrot.lane.b32.xlu0 %v1350_v27, %s1391_s19  ;;  %v1247_v63 = vmul.f32 -1.442695, %v930_v53 }
 0xe7d   :  { %1353 = vpow2.f32 %v1245_v62 }
 0xe7e   :  { %1355 = vpow2.f32 %v1247_v63 }
 0xe82   :  { %v1352_v61 = vpop.eup %1351 }
 0xe83   :  { %956 = vrot.lane.b32.xlu1 %v1352_v61, %s1391_s19  ;;  %v1354_v1 = vpop.eup %1353 }
 0xe84   :  { %v868_v49 = vadd.f32 1.0, %v1354_v1  ;;  %v1356_v0 = vpop.eup %1355 }
 0xe85   :  { %v934_v45 = vadd.f32 1.0, %v1356_v0 }
 0xe86   :  { %1357 = vrcp.f32 %v868_v49  ;;  %v880_v37 = vand.u32 2147483648, %v868_v49  ;;  %vm874_vm4 = vweird.f32 %v868_v49  ;;  %v878_v38 = vand.u32 2147483647, %v868_v49 }
 0xe87   :  { %1359 = vrcp.f32 %v934_v45  ;;  %v946_v12 = vand.u32 2147483648, %v934_v45  ;;  %vm940_vm10 = vweird.f32 %v934_v45  ;;  %v944_v13 = vand.u32 2147483647, %v934_v45 }
 0xe88   :  { %v881_v8 = vor.u32 1.1754944e-38, %v880_v37  ;;  %vm879_vm8 = vcmp.eq.f32.partialorder %v878_v38, 8.507059e+37 }
 0xe89   :  { %v947_v10 = vor.u32 1.1754944e-38, %v946_v12  ;;  %vm945_vm12 = vcmp.eq.f32.partialorder %v944_v13, 8.507059e+37 }
 0xe8c   :  { %v1358_v2 = vpop.eup %1357 }
 0xe8d   :  { %v870_v3 = vmul.f32 %v1358_v2, %v868_v49  ;;  %v1360_v5 = vpop.eup %1359  ;;  %vm875_vm3 = vweird.f32 %v1358_v2 }
 0xe8e   :  { %v936_v33 = vmul.f32 %v1360_v5, %v934_v45  ;;  %vm876_vm7 = vmor %vm874_vm4, %vm875_vm3  ;;  %vm941_vm9 = vweird.f32 %v1360_v5 }
 0xe8f   :  { %v871_v6 = vsub.f32 1.0, %v870_v3  ;;  %vm942_vm11 = vmor %vm940_vm10, %vm941_vm9  ;;  %vm1215_vm10 = vcmask 1024  }
 0xe90   :  { %v937_v35 = vsub.f32 1.0, %v936_v33 }
 0xe91   :  { %v872_v34 = vmul.f32 %v1358_v2, %v871_v6 }
 0xe92   :  { %v938_v39 = vmul.f32 %v1360_v5, %v937_v35 }
 0xe93   :  { %v873_v36 = vadd.f32 %v1358_v2, %v872_v34 }
 0xe94   :  { %v939_v9 = vadd.f32 %v1360_v5, %v938_v39 }
 0xe95   :  { %v877_v42 = vsel %vm876_vm7, %v1358_v2, %v873_v36 }
 0xe96   :  { %v882_v55 = vsel %vm879_vm8, %v881_v8, %v877_v42  ;;  %v943_v14 = vsel %vm942_vm11, %v1360_v5, %v939_v9 }
 0xe97   :  { %v948_v16 = vsel %vm945_vm12, %v947_v10, %v943_v14  ;;  %v885_v18 = vmul.f32 %v882_v55, %v1736_v41 }
 0xe98   :  { %v954_v23 = vmul.f32 %v952_v22, %v948_v16 }
 0xeee   :  { %v888_v7 = vpop.permute.xlu0 %887 }
 0xeef   :  { %v890_v11 = vmul.f32 %v888_v7, %v882_v55 }
 0xef1   :  { %892 = vrot.lane.b32.xlu2 %v890_v11, %s1392_s3 }
 0xef5   :  { %v957_v15 = vpop.permute.xlu1 %956 }
 0xef6   :  { %v959_v17 = vmul.f32 %v957_v15, %v948_v16 }
 0xef8   :  { %961 = vrot.lane.b32.xlu0 %v959_v17, %s1392_s3 }
 0xf4b   :  { %v893_v19 = vpop.permute.xlu2 %892 }
 0xf4c   :  { %v1753_v20 = vadd.f32 %v893_v19, %v885_v18 }
 0xf4e   :  { %1361 = vtanh.f32 %v1753_v20 }
 0xf54   :  { %v1362_v21 = vpop.eup %1361 }
 0xf55   :  { %898 = vrot.lane.b32.xlu1 %v1362_v21, %s1391_s19 }
 0xf6a   :  { %v962_v24 = vpop.permute.xlu0 %961 }
 0xf6b   :  { %v1758_v25 = vadd.f32 %v962_v24, %v954_v23 }
 0xf6d   :  { %1363 = vtanh.f32 %v1758_v25  ;;  %v1092_v13 = vrot.slane %v1758_v25, 6 }
 0xf73   :  { %v1364_v26 = vpop.eup %1363 }
 0xf74   :  { %967 = vrot.lane.b32.xlu2 %v1364_v26, %s1391_s19 }
 0xfc7   :  { %v899_v29 = vpop.permute.xlu1 %898 }
 0xfc8   :  { %v901_v30 = vmul.f32 %v899_v29, %v882_v55 }
 0xfca   :  { %v976_v32 = vrot.slane %v901_v30, 4 }
 0xfcc   :  { %977 = vrot.lane.b32.xlu1 %v976_v32, %s1391_s19 }
 0xfce   :  { %v968_v41 = vpop.permute.xlu2 %967 }
 0xfcf   :  { %v970_v43 = vmul.f32 %v968_v41, %v948_v16 }
 0xfd1   :  { %v1042_v44 = vrot.slane %v970_v43, 4  ;;  %972 = vrot.lane.b32.xlu0 %v970_v43, %s1392_s3 }
 0xfd3   :  { %1043 = vrot.lane.b32.xlu2 %v1042_v44, %s1392_s3 }
0x102d   :  { %v1044_v28 = vpop.permute.xlu2 %1043 }
0x102e   :  { %1250 = vmatmul.msk.f32.vlgmr.msra.gmra.mxu1 %vm82_vm5, %v1044_v28 }
0x103e   :  { %v978_v46 = vpop.permute.xlu1 %977 }
0x1043   :  { %v973_v48 = vpop.permute.xlu0 %972 }
0x1044   :  { %v980_v31 = vsel %vm82_vm5, %v973_v48, %v978_v46 }
0x1045   :  { %v982_v50 = vrot.slane %v980_v31, 4 }
0x1047   :  { %1248 = vmatmul.msk.f32.vlgmr.msrb.gmra.mxu3 %vm152_vm6, %v982_v50 }
0x10ab   :  { %v1064_v51 = vpop.f32.mrf.mxu1 }
0x10ac   :  { %v1068_v47 = vrot.slane %v1064_v51, 2 }
0x10ae   :  { %v1070_v52 = vadd.f32 %v1068_v47, %v1701_v4 }
0x10b0   :  { %1365 = vtanh.f32 %v1070_v52  ;;  %v1251_v59 = vmul.f32 -1.442695, %v1070_v52 }
0x10b6   :  { %v1366_v40 = vpop.eup %1365 }
0x10b7   :  { %1096 = vrot.lane.b32.xlu1 %v1366_v40, %s1391_s19 }
0x10ca   :  { %v1002_v54 = vpop.f32.mrf.mxu3 }
0x10cb   :  { %v1003_v57 = vadd.f32 %v1773_v56, %v1002_v54 }
0x10cd   :  { %1367 = vtanh.f32 %v1003_v57  ;;  %v1249_v61 = vmul.f32 -1.442695, %v1003_v57 }
0x10ce   :  { %1369 = vpow2.f32 %v1251_v59 }
0x10d3   :  { %v1368_v58 = vpop.eup %1367 }
0x10d4   :  { %1027 = vrot.lane.b32.xlu0 %v1368_v58, %s1391_s19  ;;  %v1370_v60 = vpop.eup %1369 }
0x10d5   :  { %v1074_v4 = vadd.f32 1.0, %v1370_v60 }
0x10d7   :  { %1371 = vrcp.f32 %v1074_v4  ;;  %v1086_v0 = vand.u32 2147483648, %v1074_v4  ;;  %vm1080_vm14 = vweird.f32 %v1074_v4  ;;  %v1084_v45 = vand.u32 2147483647, %v1074_v4 }
0x10d8   :  { %1373 = vpow2.f32 %v1249_v61 }
0x10d9   :  { %v1087_v5 = vor.u32 1.1754944e-38, %v1086_v0  ;;  %vm1085_vm0 = vcmp.eq.f32.partialorder %v1084_v45, 8.507059e+37 }
0x10dd   :  { %v1372_v53 = vpop.eup %1371 }
0x10de   :  { %v1076_v27 = vmul.f32 %v1372_v53, %v1074_v4  ;;  %vm1081_vm13 = vweird.f32 %v1372_v53  ;;  %v1374_v49 = vpop.eup %1373 }
0x10df   :  { %vm1082_vm15 = vmor %vm1080_vm14, %vm1081_vm13  ;;  %v1008_v2 = vadd.f32 1.0, %v1374_v49  ;;  %v1182_v49 = vld [vmem:[%s1817_s6] sm:$0xff] }
0x10e0   :  { %v1077_v62 = vsub.f32 1.0, %v1076_v27 }
0x10e1   :  { %1375 = vrcp.f32 %v1008_v2  ;;  %v1020_v42 = vand.u32 2147483648, %v1008_v2  ;;  %vm1014_vm2 = vweird.f32 %v1008_v2  ;;  %v1018_v8 = vand.u32 2147483647, %v1008_v2 }
0x10e2   :  { %v1078_v63 = vmul.f32 %v1372_v53, %v1077_v62  ;;  %v1185_v62 = vld [vmem:[%s1817_s6 + $0x18] sm:$0xff] }
0x10e3   :  { %v1021_v7 = vor.u32 1.1754944e-38, %v1020_v42  ;;  %vm1019_vm4 = vcmp.eq.f32.partialorder %v1018_v8, 8.507059e+37  ;;  %1207 = vmatpush.msra.mxu0 %v1185_v62 }
0x10e4   :  { %v1079_v1 = vadd.f32 %v1372_v53, %v1078_v63  ;;  %v1184_v63 = vld [vmem:[%s1817_s6 + $0x10] sm:$0xff] }
0x10e5   :  { %1208 = vmatpush.msra.mxu0 %v1184_v63 }
0x10e6   :  { %v1083_v3 = vsel %vm1082_vm15, %v1372_v53, %v1079_v1  ;;  %v1183_v1 = vld [vmem:[%s1817_s6 + $0x8] sm:$0xff] }
0x10e7   :  { %v1088_v33 = vsel %vm1085_vm0, %v1087_v5, %v1083_v3  ;;  %v1376_v35 = vpop.eup %1375  ;;  %1209 = vmatpush.msra.mxu0 %v1183_v1 }
0x10e8   :  { %v1010_v36 = vmul.f32 %v1376_v35, %v1008_v2  ;;  %vm1015_vm1 = vweird.f32 %v1376_v35  ;;  %v1094_v14 = vmul.f32 %v1092_v13, %v1088_v33  ;;  %v13_v2 = vstv %s1818_s7 }
0x10e9   :  { %vm1016_vm3 = vmor %vm1014_vm2, %vm1015_vm1  ;;  %1210 = vmatpush.msra.mxu0 %v1182_v49  ;;  %14 = vst [vmem:[#allocation2] sm:$0x1] %v13_v2 }
0x10ea   :  { %v1011_v37 = vsub.f32 1.0, %v1010_v36 }
0x10ec   :  { %v1012_v38 = vmul.f32 %v1376_v35, %v1011_v37 }
0x10ee   :  { %v1013_v39 = vadd.f32 %v1376_v35, %v1012_v38 }
0x10f0   :  { %v1017_v55 = vsel %vm1016_vm3, %v1376_v35, %v1013_v39  ;;  %v1260_v5 = vld [vmem:[#allocation2] ss:$0 sm:$0xff] }
0x10f1   :  { %v1022_v11 = vsel %vm1019_vm4, %v1021_v7, %v1017_v55 }
0x10f2   :  { %v1025_v16 = vmul.f32 %v1022_v11, %v1753_v20 }
0x1129   :  { %v1097_v6 = vpop.permute.xlu1 %1096 }
0x112a   :  { %v1099_v34 = vmul.f32 %v1097_v6, %v1088_v33 }
0x112c   :  { %1101 = vrot.lane.b32.xlu0 %v1099_v34, %s1392_s3 }
0x1146   :  { %v1028_v9 = vpop.permute.xlu0 %1027 }
0x1147   :  { %v1030_v12 = vmul.f32 %v1028_v9, %v1022_v11 }
0x1149   :  { %1032 = vrot.lane.b32.xlu2 %v1030_v12, %s1392_s3 }
0x119e   :  { %v1102_v10 = vpop.permute.xlu0 %1101 }
0x119f   :  { %v1104_v15 = vadd.f32 %v1102_v10, %v1094_v14 }
0x11a1   :  { %1377 = vtanh.f32 %v1104_v15 }
0x11a3   :  { %v1033_v17 = vpop.permute.xlu2 %1032 }
0x11a4   :  { %v1035_v18 = vadd.f32 %v1033_v17, %v1025_v16 }
0x11a6   :  { %1379 = vtanh.f32 %v1035_v18 }
0x11a7   :  { %v1378_v19 = vpop.eup %1377 }
0x11a8   :  { %1107 = vrot.lane.b32.xlu2 %v1378_v19, %s1391_s19 }
0x11ac   :  { %v1380_v21 = vpop.eup %1379 }
0x11ad   :  { %1038 = vrot.lane.b32.xlu1 %v1380_v21, %s1391_s19 }
0x1202   :  { %v1108_v22 = vpop.permute.xlu2 %1107 }
0x1203   :  { %v1110_v23 = vmul.f32 %v1108_v22, %v1088_v33 }
0x1205   :  { %1112 = vrot.lane.b32.xlu0 %v1110_v23, %s1392_s3 }
0x121f   :  { %v1039_v24 = vpop.permute.xlu1 %1038 }
0x1220   :  { %v1041_v25 = vmul.f32 %v1039_v24, %v1022_v11 }
0x1222   :  { %v1116_v26 = vrot.slane %v1041_v25, 2 }
0x1224   :  { %1117 = vrot.lane.b32.xlu1 %v1116_v26, %s1391_s19 }
0x1277   :  { %v1113_v29 = vpop.permute.xlu0 %1112 }
0x1296   :  { %v1118_v20 = vpop.permute.xlu1 %1117 }
0x1297   :  { %v1120_v30 = vsel %vm82_vm5, %v1113_v29, %v1118_v20 }
0x1298   :  { %v1122_v32 = vrot.slane %v1120_v30, 6 }
0x129a   :  { %1252 = vmatmul.msk.f32.vlgmr.msrb.gmra.mxu2 %vm152_vm6, %v1122_v32 }
0x131d   :  { %v1142_v41 = vpop.f32.mrf.mxu2 }
0x131e   :  { %v1143_v43 = vadd.f32 %v1773_v56, %v1142_v41 }
0x1320   :  { %1381 = vtanh.f32 %v1143_v43  ;;  %v1253_v28 = vmul.f32 -1.442695, %v1143_v43 }
0x1322   :  { %1383 = vpow2.f32 %v1253_v28 }
0x1326   :  { %v1382_v44 = vpop.eup %1381 }
0x1327   :  { %1167 = vrot.lane.b32.xlu2 %v1382_v44, %s1391_s19 }
0x1328   :  { %v1384_v46 = vpop.eup %1383 }
0x1329   :  { %v1148_v48 = vadd.f32 1.0, %v1384_v46 }
0x132b   :  { %1385 = vrcp.f32 %v1148_v48  ;;  %v1160_v40 = vand.u32 2147483648, %v1148_v48  ;;  %vm1154_vm6 = vweird.f32 %v1148_v48  ;;  %v1158_v54 = vand.u32 2147483647, %v1148_v48 }
0x132d   :  { %v1161_v57 = vor.u32 1.1754944e-38, %v1160_v40  ;;  %vm1159_vm9 = vcmp.eq.f32.partialorder %v1158_v54, 8.507059e+37 }
0x1331   :  { %v1386_v31 = vpop.eup %1385 }
0x1332   :  { %v1150_v50 = vmul.f32 %v1386_v31, %v1148_v48  ;;  %vm1155_vm7 = vweird.f32 %v1386_v31 }
0x1333   :  { %vm1156_vm8 = vmor %vm1154_vm6, %vm1155_vm7 }
0x1334   :  { %v1151_v51 = vsub.f32 1.0, %v1150_v50 }
0x1336   :  { %v1152_v47 = vmul.f32 %v1386_v31, %v1151_v51 }
0x1338   :  { %v1153_v52 = vadd.f32 %v1386_v31, %v1152_v47 }
0x133a   :  { %v1157_v56 = vsel %vm1156_vm8, %v1386_v31, %v1153_v52 }
0x133b   :  { %v1162_v59 = vsel %vm1159_vm9, %v1161_v57, %v1157_v56 }
0x133c   :  { %v1165_v4 = vmul.f32 %v1162_v59, %v1035_v18 }
0x1381   :  { %v1168_v58 = vpop.permute.xlu2 %1167 }
0x1382   :  { %v1170_v60 = vmul.f32 %v1168_v58, %v1162_v59 }
0x1384   :  { %1172 = vrot.lane.b32.xlu0 %v1170_v60, %s1392_s3 }
0x13f6   :  { %v1173_v53 = vpop.permute.xlu0 %1172 }
0x13f7   :  { %v1175_v27 = vadd.f32 %v1173_v53, %v1165_v4 }
0x13f9   :  { %1387 = vtanh.f32 %v1175_v27 }
0x13ff   :  { %v1388_v61 = vpop.eup %1387 }
0x1400   :  { %1178 = vrot.lane.b32.xlu1 %v1388_v61, %s1391_s19 }
0x1472   :  { %v1179_v0 = vpop.permute.xlu1 %1178 }
0x1473   :  { %v1181_v45 = vmul.f32 %v1179_v0, %v1162_v59 }
0x1475   :  { %1191 = vrot.lane.b32.xlu2 %v1181_v45, %s1392_s3 }
0x14cf   :  { %v1192_v3 = vpop.permute.xlu2 %1191 }
0x14d0   :  { %1254 = vmatmul.msk.f32.vlgmr.msra.gmra.mxu0 %vm82_vm5, %v1192_v3 }
0x154d   :  { %v1212_v6 = vpop.f32.mrf.mxu0 }
0x154e   :  { %v1213_v33 = vadd.f32 %v1260_v5, %v1212_v6 }
0x1550   :  { %1216 = vst.msk [vmem:[%s1819_s8] sm:$0x3] %vm1215_vm10, %v1213_v33 }

</bundles_post_ra>
